<compile_context>
chip_gen: v6e
topology: v6e:2x2x1
jax: 0.10.0
libtpu: 0.0.40
codegen_flags: <defaults>
</compile_context>

<pallas_src>
import functools
import math

import jax
import jax.numpy as jnp
from jax.experimental import pallas as pl
from jax.experimental.pallas import tpu as pltpu

_LANE = 128
_L_CHUNK = 512  # channels-first accumulator chunk (<= ~32 vregs of f32 acc)


def _round_up(x, m):
    return ((x + m - 1) // m) * m


_VMEM_LIMIT_CACHE = [None]


def _vmem_limit_bytes():
    # ~3/4 of physical per-core VMEM (v7x only has 64 MiB; a hard-coded 64 MiB
    # would leave no headroom there, while 96 MiB is fine on v5e/v6e).
    if _VMEM_LIMIT_CACHE[0] is None:
        cap = 64 * 1024 * 1024
        try:
            cap = int(pltpu.get_tpu_info().vmem_capacity_bytes)
        except Exception:
            pass
        _VMEM_LIMIT_CACHE[0] = int(min(cap * 3 // 4, 96 * 1024 * 1024))
    return _VMEM_LIMIT_CACHE[0]


# ---------------- fc1: Linear(latent_dim -> init_dim * init_channels) --------

def _linear_kernel(x_ref, w_ref, b_ref, o_ref):
    x = x_ref[...].astype(w_ref.dtype)
    acc = jnp.dot(x, w_ref[...], preferred_element_type=jnp.float32)
    o_ref[...] = (acc + b_ref[...]).astype(o_ref.dtype)


def linear(x, w, b2d, *, out_dtype):
    B, D_in = x.shape
    D_out = w.shape[1]
    return pl.pallas_call(
        _linear_kernel,
        out_shape=jax.ShapeDtypeStruct((B, D_out), out_dtype),
        grid=(1,),
        in_specs=[
            pl.BlockSpec((B, D_in), lambda i: (0, 0)),
            pl.BlockSpec((D_in, D_out), lambda i: (0, 0)),
            pl.BlockSpec((1, D_out), lambda i: (0, 0)),
        ],
        out_specs=pl.BlockSpec((B, D_out), lambda i: (0, 0)),
        compiler_params=pltpu.CompilerParams(
            dimension_semantics=("arbitrary",),
            vmem_limit_bytes=_vmem_limit_bytes()),
    )(x, w, b2d)


# -------- wide layers: fused channels-last ConvTranspose1d (stride 2) --------

def _deconv_fused_kernel(x_ref, w_ref, b_ref, o_ref, xpad_ref, xg_ref, *,
                         bt, l_in, c_in, n_shift, pad, off, halo_hi,
                         apply_relu):
    zeros_lo = jnp.zeros((off, c_in), xpad_ref.dtype)
    zeros_hi = jnp.zeros((halo_hi, c_in), xpad_ref.dtype)
    for b in range(bt):
        xpad_ref[b, 0:off, :] = zeros_lo
        xpad_ref[b, off + l_in:off + l_in + halo_hi, :] = zeros_hi
        xpad_ref[b, off:off + l_in, :] = x_ref[b]      # aligned body copy
    # Lane-aligned im2col gather (column offsets are multiples of 128).
    # TODO(synk): on v5e consider per-tap accumulating dots instead of this
    # gather (relieves the single vector-store slot); kept fused here so the
    # 256-deep MXUs of v6e/v7x see one big contraction.
    for b in range(bt):
        for j in range(n_shift):
            r0 = off - pad + j
            xg_ref[b * l_in:(b + 1) * l_in, j * c_in:(j + 1) * c_in] = (
                xpad_ref[b, r0:r0 + l_in, :].astype(xg_ref.dtype))
    # One MXU call with M = bt * l_in rows; both output phases share the
    # output lanes (2 * C_out wide).
    acc = jnp.dot(xg_ref[...], w_ref[...], preferred_element_type=jnp.float32)
    acc = acc + b_ref[...]
    if apply_relu:
        acc = jnp.maximum(acc, 0.0)
    o_ref[...] = acc.reshape(o_ref.shape).astype(o_ref.dtype)


def _pick_batch_tile(B, l_in, c_in, S, c2, itemsize):
    """Largest divisor of B whose block footprint fits a modest VMEM budget,
    stopping once the matmul M dimension (bt*l_in) reaches ~256 rows."""
    budget = 16 * 1024 * 1024
    best = 1
    for bt in range(1, B + 1):
        if B % bt:
            continue
        rows = bt * l_in
        approx = (2 * bt * l_in * c_in * itemsize        # x block (dbl-buffered)
                  + bt * (l_in + 32) * c_in * itemsize   # padded scratch
                  + rows * S * c_in * itemsize           # im2col scratch
                  + 2 * bt * l_in * c2 * 4)              # out block (f32 worst)
        if approx > budget:
            break
        best = bt
        if rows >= 256:
            break
    return best


def deconv_fused(x_nlc, w2d, b2, *, apply_relu, out_dtype):
    """x_nlc: (B, L_in, C_in); w2d: (S*C_in, 2*C_out); b2: (1, 2*C_out).
    Returns (B, L_in, 2*C_out); reshaping to (B, 2*L_in, C_out) interleaves
    the two output phases for free."""
    B, L_in, C_in = x_nlc.shape
    SC, C2 = w2d.shape
    S = SC // C_in
    pad = (S - 1) // 2
    off = max(8, _round_up(pad, 8))          # sublane-aligned body offset
    halo_hi = max(8, _round_up(pad, 8))
    L_alloc = off + L_in + halo_hi
    bt = _pick_batch_tile(B, L_in, C_in, S, C2, x_nlc.dtype.itemsize)

    kernel = functools.partial(
        _deconv_fused_kernel, bt=bt, l_in=L_in, c_in=C_in, n_shift=S, pad=pad,
        off=off, halo_hi=halo_hi, apply_relu=apply_relu)
    # TODO(synk): mark the grid-invariant w/b specs pipeline_mode=pl.Buffered(1)
    # to single-buffer them (VMEM saving that matters on v7x for huge weights).
    return pl.pallas_call(
        kernel,
        out_shape=jax.ShapeDtypeStruct((B, L_in, C2), out_dtype),
        grid=(B // bt,),
        in_specs=[
            pl.BlockSpec((bt, L_in, C_in), lambda i: (i, 0, 0)),
            pl.BlockSpec((SC, C2), lambda i: (0, 0)),
            pl.BlockSpec((1, C2), lambda i: (0, 0)),
        ],
        out_specs=pl.BlockSpec((bt, L_in, C2), lambda i: (i, 0, 0)),
        scratch_shapes=[
            pltpu.VMEM((bt, L_alloc, C_in), x_nlc.dtype),
            pltpu.VMEM((bt * L_in, SC), w2d.dtype),
        ],
        compiler_params=pltpu.CompilerParams(
            dimension_semantics=("parallel",),
            vmem_limit_bytes=_vmem_limit_bytes()),
    )(x_nlc, w2d, b2)


# ----- narrow tail layers: channels-first ConvTranspose1d (lane-dense L) -----

def _deconv_cf_kernel(x_ref, w_ref, b_ref, o_ref, xpad_ref, *,
                      l_in, c_in, c2, n_shift, pad, off, apply_relu):
    zeros = jnp.zeros((c_in, _LANE), xpad_ref.dtype)
    xpad_ref[:, 0:off] = zeros                           # halo (lane-aligned)
    xpad_ref[:, off + l_in:off + l_in + _LANE] = zeros   # halo
    xpad_ref[:, off:off + l_in] = x_ref[0]               # lane-aligned body
    bias = b_ref[...]                                    # (c2, 1) f32
    for u0 in range(0, l_in, _L_CHUNK):                  # keeps acc in vregs
        lt = min(_L_CHUNK, l_in - u0)
        acc = jnp.zeros((c2, lt), jnp.float32)
        for j in range(n_shift):
            xs = xpad_ref[:, off - pad + j + u0:off - pad + j + u0 + lt]
            acc = acc + jnp.dot(w_ref[j], xs,
                                preferred_element_type=jnp.float32)
        acc = acc + bias
        if apply_relu:
            acc = jnp.maximum(acc, 0.0)
        o_ref[0, :, u0:u0 + lt] = acc.astype(o_ref.dtype)


def deconv_cf(x_ncl, w_cf, b_cf, *, apply_relu, out_dtype):
    """x_ncl: (B, C_in, L_in); w_cf: (S, 2*C_out, C_in); b_cf: (2*C_out, 1).
    Returns (B, 2*C_out, L_in) with phase-major rows: out[:, r*C_out + c, u]
    is output position 2*u + r of channel c."""
    B, C_in, L_in = x_ncl.shape
    S, C2, c_in_w = w_cf.shape
    assert c_in_w == C_in
    pad = (S - 1) // 2
    off = _LANE                              # lane-aligned body offset
    L_alloc = off + L_in + _LANE

    kernel = functools.partial(
        _deconv_cf_kernel, l_in=L_in, c_in=C_in, c2=C2, n_shift=S, pad=pad,
        off=off, apply_relu=apply_relu)
    return pl.pallas_call(
        kernel,
        out_shape=jax.ShapeDtypeStruct((B, C2, L_in), out_dtype),
        grid=(B,),
        in_specs=[
            pl.BlockSpec((1, C_in, L_in), lambda b: (b, 0, 0)),
            pl.BlockSpec((S, C2, C_in), lambda b: (0, 0, 0)),
            pl.BlockSpec((C2, 1), lambda b: (0, 0)),
        ],
        out_specs=pl.BlockSpec((1, C2, L_in), lambda b: (b, 0, 0)),
        scratch_shapes=[pltpu.VMEM((C_in, L_alloc), x_ncl.dtype)],
        compiler_params=pltpu.CompilerParams(
            dimension_semantics=("parallel",),
            vmem_limit_bytes=_vmem_limit_bytes()),
    )(x_ncl, w_cf, b_cf)


# ----------------------------- parameters ------------------------------------

def init_wavegan_params(key, *, latent_dim, init_dim, init_channels,
                        output_size, output_channels, kernel_size):
    deconv_layers = int(math.log2(output_size // init_dim)) - 1
    scale = 0.1
    keys = iter(jax.random.split(key, 2 * (deconv_layers + 2)))
    params = {
        "fc_w": scale * jax.random.normal(
            next(keys), (latent_dim, init_channels * init_dim), jnp.float32),
        "fc_b": scale * jax.random.normal(
            next(keys), (init_channels * init_dim,), jnp.float32),
        "deconvs": [],
    }
    c = init_channels
    for _ in range(deconv_layers):
        w = scale * jax.random.normal(next(keys), (kernel_size, c, c // 2),
                                      jnp.float32)
        bb = scale * jax.random.normal(next(keys), (c // 2,), jnp.float32)
        params["deconvs"].append((w, bb))
        c //= 2
    params["out_w"] = scale * jax.random.normal(
        next(keys), (kernel_size, c, output_channels), jnp.float32)
    params["out_b"] = scale * jax.random.normal(
        next(keys), (output_channels,), jnp.float32)
    return params


def _fuse_deconv_weight(w_kio, b, *, stride, padding):
    """Fold the K taps and the 2 output phases of a stride-2 ConvTranspose1d
    into (S, C_in, 2*C_out) shift-tap matrices (done once, outside kernels)."""
    K, C_in, C_out = w_kio.shape
    assert stride == 2 and K % 2 == 0 and padding == K // 2 - 1
    Kh = K // 2
    s_min = -(Kh // 2)
    S = 2 * (Kh // 2) + 1
    zeros = jnp.zeros((C_in, C_out), w_kio.dtype)
    taps = []
    for j in range(S):
        s = s_min + j
        phases = []
        for r in range(2):                    # out[2u + r] uses x[u + s] @ w[k]
            k = r + Kh - 1 - 2 * s
            phases.append(w_kio[k] if 0 <= k < K else zeros)
        taps.append(jnp.concatenate(phases, axis=-1))        # (C_in, 2*C_out)
    wc = jnp.stack(taps, axis=0)                              # (S, C_in, 2*C_out)
    b2 = jnp.concatenate([b, b])                              # (2*C_out,)
    return wc, b2


def prepare_params(params, *, init_dim, stride, padding,
                   compute_dtype=jnp.bfloat16):
    """Torch-layout params -> kernel-ready params (arrays only, jit-friendly).
    Wide layers get a 2-D fused im2col weight (channels-last path); narrow
    tail layers get per-tap transposed weights (channels-first path)."""
    latent, D = params["fc_w"].shape
    C0 = D // init_dim
    layers = list(params["deconvs"]) + [(params["out_w"], params["out_b"])]
    ws, bs = [], []
    c_in = C0
    for (w, b) in layers:
        _, c_in_w, c_out = w.shape
        assert c_in_w == c_in
        wc, b2 = _fuse_deconv_weight(w, b, stride=stride, padding=padding)
        S, _, C2 = wc.shape
        if c_in % 128 == 0 and C2 % 128 == 0:                 # fused path (2-D w)
            ws.append(wc.reshape(S * c_in, C2).astype(compute_dtype))
            bs.append(b2.reshape(1, C2).astype(jnp.float32))
        else:                                                 # channels-first (3-D w)
            ws.append(jnp.transpose(wc, (0, 2, 1)).astype(compute_dtype))
            bs.append(b2.reshape(C2, 1).astype(jnp.float32))
        c_in = c_out
    if ws[0].ndim == 2:
        # First deconv is channels-last: permute fc columns so the fc output is
        # already (B, L0, C0) after a free reshape.
        fc_w = params["fc_w"].reshape(latent, C0, init_dim)
        fc_w = jnp.transpose(fc_w, (0, 2, 1)).reshape(latent, D)
        fc_b = jnp.transpose(params["fc_b"].reshape(C0, init_dim)).reshape(D)
    else:
        # First deconv is channels-first: torch's natural column order already
        # reshapes to (B, C0, L0) for free.
        fc_w, fc_b = params["fc_w"], params["fc_b"]
    return {"fc_w": fc_w.astype(compute_dtype),
            "fc_b": fc_b.reshape(1, D).astype(jnp.float32),
            "w": ws, "b": bs}


# ------------------------------ forward --------------------------------------

def wavegan_generator_forward(prep, z, *, init_dim):
    """z: (B, latent_dim) -> (B, output_channels, output_size) (NCL)."""
    B = z.shape[0]
    act_dtype = prep["fc_w"].dtype
    n_layers = len(prep["w"])
    D = prep["fc_w"].shape[1]
    C0 = D // init_dim

    h = linear(z, prep["fc_w"], prep["fc_b"], out_dtype=act_dtype)
    if prep["w"][0].ndim == 2:
        h = h.reshape(B, init_dim, C0)          # channels-last, free reshape
        layout = "NLC"
    else:
        h = h.reshape(B, C0, init_dim)          # channels-first, free reshape
        layout = "NCL"

    for i in range(n_layers):
        is_last = i == n_layers - 1
        out_dtype = jnp.float32 if is_last else act_dtype
        w, b = prep["w"][i], prep["b"][i]
        if w.ndim == 2:                         # fused channels-last layer
            if layout == "NCL":
                h = jnp.transpose(h, (0, 2, 1))
                layout = "NLC"
            h = deconv_fused(h, w, b, apply_relu=not is_last,
                             out_dtype=out_dtype)
            _, L, C2 = h.shape
            h = h.reshape(B, 2 * L, C2 // 2)    # phase interleave: free reshape
        else:                                   # channels-first tail layer
            if layout == "NLC":
                h = jnp.transpose(h, (0, 2, 1))
                layout = "NCL"
            h = deconv_cf(h, w, b, apply_relu=not is_last, out_dtype=out_dtype)
            _, C2, L = h.shape
            c_out = C2 // 2
            # tiny even/odd interleave of an activation-sized tensor (NCL out)
            h = h.reshape(B, 2, c_out, L)
            h = jnp.transpose(h, (0, 2, 3, 1)).reshape(B, c_out, 2 * L)
    if layout == "NLC":
        h = jnp.transpose(h, (0, 2, 1))
    return h


# --------------------------- pure-JAX reference -------------------------------

def _ref_conv_transpose1d(x_ncl, w_kio, b, stride, padding):
    K = w_kio.shape[0]
    w_oik = jnp.transpose(w_kio, (2, 1, 0))[:, :, ::-1]     # (C_out, C_in, K) flipped
    y = jax.lax.conv_general_dilated(
        x_ncl, w_oik, window_strides=(1,),
        padding=[(K - 1 - padding, K - 1 - padding)],
        lhs_dilation=(stride,),
        dimension_numbers=("NCH", "OIH", "NCH"))
    return y + b[None, :, None]


def _ref_forward(params, z, *, init_dim, init_channels, stride, padding):
    B = z.shape[0]
    h = z @ params["fc_w"] + params["fc_b"]
    h = h.reshape(B, init_channels, init_dim)
    for (w, bb) in params["deconvs"]:
        h = jax.nn.relu(_ref_conv_transpose1d(h, w, bb, stride, padding))
    return _ref_conv_transpose1d(h, params["out_w"], params["out_b"],
                                 stride, padding)


# ------------------------------------------------------------------------------

if __name__ == "__main__":
    configs = [
        # all-narrow config: exercises the channels-first tail path end to end
        dict(latent_dim=32, init_dim=8, init_channels=32, output_size=64,
             output_channels=4, kernel_size=8, batch=2),
        # C_in = 128 first layer: exercises the fused batch-tiled MXU path,
        # the NLC->NCL handoff, and the channels-first final layer (odd batch)
        dict(latent_dim=16, init_dim=8, init_channels=128, output_size=32,
             output_channels=4, kernel_size=8, batch=3),
    ]
    tols = {jnp.float32: 2e-3, jnp.bfloat16: 2e-1}

    key = jax.random.PRNGKey(0)
    for cfg in configs:
        stride = 2
        padding = cfg["kernel_size"] // 2 - 1
        key, pkey, zkey = jax.random.split(key, 3)
        params = init_wavegan_params(
            pkey, latent_dim=cfg["latent_dim"], init_dim=cfg["init_dim"],
            init_channels=cfg["init_channels"], output_size=cfg["output_size"],
            output_channels=cfg["output_channels"],
            kernel_size=cfg["kernel_size"])
        z = jax.random.normal(zkey, (cfg["batch"], cfg["latent_dim"]),
                              jnp.float32)

        ref = _ref_forward(params, z, init_dim=cfg["init_dim"],
                           init_channels=cfg["init_channels"],
                           stride=stride, padding=padding)
        ref = jax.block_until_ready(ref)

        for dtype, tol in tols.items():
            prep = prepare_params(params, init_dim=cfg["init_dim"],
                                  stride=stride, padding=padding,
                                  compute_dtype=dtype)
            fwd = jax.jit(functools.partial(wavegan_generator_forward,
                                            init_dim=cfg["init_dim"]))
            out = jax.block_until_ready(fwd(prep, z))
            assert out.shape == (cfg["batch"], cfg["output_channels"],
                                 cfg["output_size"]), out.shape
            assert bool(jnp.allclose(out, ref, atol=tol, rtol=tol)), (
                str(dtype), float(jnp.max(jnp.abs(out - ref))))

    print("KERNEL_OK")
</pallas_src>

<mosaic_0001>
module attributes {stable_mosaic.version = 11 : i64} {
  func.func @_deconv_cf_kernel(%arg0: i32, %arg1: memref<1x32x8xf32, #tpu.memory_space<vmem>>, %arg2: memref<5x32x32xf32, #tpu.memory_space<vmem>>, %arg3: memref<32x1xf32, #tpu.memory_space<vmem>>, %arg4: memref<1x32x8xf32, #tpu.memory_space<vmem>>, %arg5: memref<32x264xf32, #tpu.memory_space<vmem>>) attributes {dimension_semantics = [#tpu.dimension_semantics<parallel>], iteration_bounds = array<i64: 2>, scalar_prefetch = 0 : i64, scratch_operands = 1 : i64, tpu.core_type = #tpu.core_type<tc>, window_params = [{transform_indices = @transform_0, window_bounds = array<i64: 1, 32, 8>}, {pipeline_mode = #tpu.pipeline_mode<synchronous>, transform_indices = @transform_1, window_bounds = array<i64: 5, 32, 32>}, {pipeline_mode = #tpu.pipeline_mode<synchronous>, transform_indices = @transform_2, window_bounds = array<i64: 32, 1>}, {transform_indices = @transform_3, window_bounds = array<i64: 1, 32, 8>}]} {
    %cst = arith.constant 0.000000e+00 : f32
    %0 = vector.broadcast %cst : f32 to vector<32x128xf32>
    %c0 = arith.constant 0 : index
    %c0_0 = arith.constant 0 : index
    %1 = vector.load %arg5[%c0, %c0_0] : memref<32x264xf32, #tpu.memory_space<vmem>>, vector<32x128xf32>
    tpu.vector_store %arg5[%c0, %c0_0], %0 {strides = array<i32>} : memref<32x264xf32, #tpu.memory_space<vmem>>, vector<32x128xf32>,
    %c0_1 = arith.constant 0 : index
    %c136 = arith.constant 136 : index
    %2 = vector.load %arg5[%c0_1, %c136] : memref<32x264xf32, #tpu.memory_space<vmem>>, vector<32x128xf32>
    tpu.vector_store %arg5[%c0_1, %c136], %0 {strides = array<i32>} : memref<32x264xf32, #tpu.memory_space<vmem>>, vector<32x128xf32>,
    %c0_2 = arith.constant 0 : index
    %c0_3 = arith.constant 0 : index
    %c0_4 = arith.constant 0 : index
    %3 = vector.load %arg1[%c0_2, %c0_3, %c0_4] : memref<1x32x8xf32, #tpu.memory_space<vmem>>, vector<1x32x8xf32>
    %4 = vector.shape_cast %3 : vector<1x32x8xf32> to vector<32x8xf32>
    %c0_5 = arith.constant 0 : index
    %c128 = arith.constant 128 : index
    %5 = vector.load %arg5[%c0_5, %c128] : memref<32x264xf32, #tpu.memory_space<vmem>>, vector<32x8xf32>
    tpu.vector_store %arg5[%c0_5, %c128], %4 {strides = array<i32>} : memref<32x264xf32, #tpu.memory_space<vmem>>, vector<32x8xf32>,
    %c0_6 = arith.constant 0 : index
    %c0_7 = arith.constant 0 : index
    %6 = vector.load %arg3[%c0_6, %c0_7] : memref<32x1xf32, #tpu.memory_space<vmem>>, vector<32x1xf32>
    %cst_8 = arith.constant 0.000000e+00 : f32
    %7 = vector.broadcast %cst_8 : f32 to vector<32x8xf32>
    %c0_9 = arith.constant 0 : index
    %c126 = arith.constant 126 : index
    %8 = vector.load %arg5[%c0_9, %c126] : memref<32x264xf32, #tpu.memory_space<vmem>>, vector<32x8xf32>
    %c0_10 = arith.constant 0 : index
    %c0_11 = arith.constant 0 : index
    %c0_12 = arith.constant 0 : index
    %9 = vector.load %arg2[%c0_10, %c0_11, %c0_12] : memref<5x32x32xf32, #tpu.memory_space<vmem>>, vector<1x32x32xf32>
    %10 = vector.shape_cast %9 : vector<1x32x32xf32> to vector<32x32xf32>
    %cst_13 = arith.constant dense<0.000000e+00> : vector<32x8xf32>
    %11 = tpu.matmul %10, %8, %cst_13 {dimension_numbers = #tpu.dot_dimension_numbers<[1], [0], [0], [1], [0, 0, 1, 1], [], []>} : vector<32x32xf32>, vector<32x8xf32>, vector<32x8xf32> -> vector<32x8xf32>
    %12 = arith.addf %7, %11 : vector<32x8xf32>
    %c0_14 = arith.constant 0 : index
    %c127 = arith.constant 127 : index
    %13 = vector.load %arg5[%c0_14, %c127] : memref<32x264xf32, #tpu.memory_space<vmem>>, vector<32x8xf32>
    %c1 = arith.constant 1 : index
    %c0_15 = arith.constant 0 : index
    %c0_16 = arith.constant 0 : index
    %14 = vector.load %arg2[%c1, %c0_15, %c0_16] : memref<5x32x32xf32, #tpu.memory_space<vmem>>, vector<1x32x32xf32>
    %15 = vector.shape_cast %14 : vector<1x32x32xf32> to vector<32x32xf32>
    %cst_17 = arith.constant dense<0.000000e+00> : vector<32x8xf32>
    %16 = tpu.matmul %15, %13, %cst_17 {dimension_numbers = #tpu.dot_dimension_numbers<[1], [0], [0], [1], [0, 0, 1, 1], [], []>} : vector<32x32xf32>, vector<32x8xf32>, vector<32x8xf32> -> vector<32x8xf32>
    %17 = arith.addf %12, %16 : vector<32x8xf32>
    %c0_18 = arith.constant 0 : index
    %c128_19 = arith.constant 128 : index
    %18 = vector.load %arg5[%c0_18, %c128_19] : memref<32x264xf32, #tpu.memory_space<vmem>>, vector<32x8xf32>
    %c2 = arith.constant 2 : index
    %c0_20 = arith.constant 0 : index
    %c0_21 = arith.constant 0 : index
    %19 = vector.load %arg2[%c2, %c0_20, %c0_21] : memref<5x32x32xf32, #tpu.memory_space<vmem>>, vector<1x32x32xf32>
    %20 = vector.shape_cast %19 : vector<1x32x32xf32> to vector<32x32xf32>
    %cst_22 = arith.constant dense<0.000000e+00> : vector<32x8xf32>
    %21 = tpu.matmul %20, %18, %cst_22 {dimension_numbers = #tpu.dot_dimension_numbers<[1], [0], [0], [1], [0, 0, 1, 1], [], []>} : vector<32x32xf32>, vector<32x8xf32>, vector<32x8xf32> -> vector<32x8xf32>
    %22 = arith.addf %17, %21 : vector<32x8xf32>
    %c0_23 = arith.constant 0 : index
    %c129 = arith.constant 129 : index
    %23 = vector.load %arg5[%c0_23, %c129] : memref<32x264xf32, #tpu.memory_space<vmem>>, vector<32x8xf32>
    %c3 = arith.constant 3 : index
    %c0_24 = arith.constant 0 : index
    %c0_25 = arith.constant 0 : index
    %24 = vector.load %arg2[%c3, %c0_24, %c0_25] : memref<5x32x32xf32, #tpu.memory_space<vmem>>, vector<1x32x32xf32>
    %25 = vector.shape_cast %24 : vector<1x32x32xf32> to vector<32x32xf32>
    %cst_26 = arith.constant dense<0.000000e+00> : vector<32x8xf32>
    %26 = tpu.matmul %25, %23, %cst_26 {dimension_numbers = #tpu.dot_dimension_numbers<[1], [0], [0], [1], [0, 0, 1, 1], [], []>} : vector<32x32xf32>, vector<32x8xf32>, vector<32x8xf32> -> vector<32x8xf32>
    %27 = arith.addf %22, %26 : vector<32x8xf32>
    %c0_27 = arith.constant 0 : index
    %c130 = arith.constant 130 : index
    %28 = vector.load %arg5[%c0_27, %c130] : memref<32x264xf32, #tpu.memory_space<vmem>>, vector<32x8xf32>
    %c4 = arith.constant 4 : index
    %c0_28 = arith.constant 0 : index
    %c0_29 = arith.constant 0 : index
    %29 = vector.load %arg2[%c4, %c0_28, %c0_29] : memref<5x32x32xf32, #tpu.memory_space<vmem>>, vector<1x32x32xf32>
    %30 = vector.shape_cast %29 : vector<1x32x32xf32> to vector<32x32xf32>
    %cst_30 = arith.constant dense<0.000000e+00> : vector<32x8xf32>
    %31 = tpu.matmul %30, %28, %cst_30 {dimension_numbers = #tpu.dot_dimension_numbers<[1], [0], [0], [1], [0, 0, 1, 1], [], []>} : vector<32x32xf32>, vector<32x8xf32>, vector<32x8xf32> -> vector<32x8xf32>
    %32 = arith.addf %27, %31 : vector<32x8xf32>
    %33 = vector.broadcast %6 : vector<32x1xf32> to vector<32x8xf32>
    %34 = arith.addf %32, %33 : vector<32x8xf32>
    %cst_31 = arith.constant 0.000000e+00 : f32
    %35 = vector.broadcast %cst_31 : f32 to vector<32x8xf32>
    %36 = arith.maximumf %34, %35 : vector<32x8xf32>
    %c0_32 = arith.constant 0 : index
    %c0_33 = arith.constant 0 : index
    %c0_34 = arith.constant 0 : index
    %37 = vector.load %arg4[%c0_32, %c0_33, %c0_34] : memref<1x32x8xf32, #tpu.memory_space<vmem>>, vector<1x32x8xf32>
    %38 = vector.shape_cast %37 : vector<1x32x8xf32> to vector<32x8xf32>
    %39 = vector.shape_cast %36 : vector<32x8xf32> to vector<1x32x8xf32>
    tpu.vector_store %arg4[%c0_32, %c0_33, %c0_34], %39 {strides = array<i32>} : memref<1x32x8xf32, #tpu.memory_space<vmem>>, vector<1x32x8xf32>,
    return
  }
  func.func @transform_0(%arg0: i32) -> (i32, i32, i32) {
    %c0_i32 = arith.constant 0 : i32
    %c0_i32_0 = arith.constant 0 : i32
    %c0_i32_1 = arith.constant 0 : i32
    return %arg0, %c0_i32, %c0_i32_0 : i32, i32, i32
  }
  func.func @transform_1(%arg0: i32) -> (i32, i32, i32) {
    %c0_i32 = arith.constant 0 : i32
    %c0_i32_0 = arith.constant 0 : i32
    %c0_i32_1 = arith.constant 0 : i32
    %c0_i32_2 = arith.constant 0 : i32
    return %c0_i32, %c0_i32_0, %c0_i32_1 : i32, i32, i32
  }
  func.func @transform_2(%arg0: i32) -> (i32, i32) {
    %c0_i32 = arith.constant 0 : i32
    %c0_i32_0 = arith.constant 0 : i32
    %c0_i32_1 = arith.constant 0 : i32
    return %c0_i32, %c0_i32_0 : i32, i32
  }
  func.func @transform_3(%arg0: i32) -> (i32, i32, i32) {
    %c0_i32 = arith.constant 0 : i32
    %c0_i32_0 = arith.constant 0 : i32
    %c0_i32_1 = arith.constant 0 : i32
    return %arg0, %c0_i32, %c0_i32_0 : i32, i32, i32
  }
}

module attributes {stable_mosaic.version = 11 : i64} {
  func.func @_linear_kernel(%arg0: i32, %arg1: memref<2x32xf32, #tpu.memory_space<vmem>>, %arg2: memref<32x256xf32, #tpu.memory_space<vmem>>, %arg3: memref<1x256xf32, #tpu.memory_space<vmem>>, %arg4: memref<2x256xf32, #tpu.memory_space<vmem>>) attributes {dimension_semantics = [#tpu.dimension_semantics<arbitrary>], iteration_bounds = array<i64: 1>, scalar_prefetch = 0 : i64, scratch_operands = 0 : i64, tpu.core_type = #tpu.core_type<tc>, window_params = [{pipeline_mode = #tpu.pipeline_mode<synchronous>, transform_indices = @transform_0, window_bounds = array<i64: 2, 32>}, {pipeline_mode = #tpu.pipeline_mode<synchronous>, transform_indices = @transform_1, window_bounds = array<i64: 32, 256>}, {pipeline_mode = #tpu.pipeline_mode<synchronous>, transform_indices = @transform_2, window_bounds = array<i64: 1, 256>}, {pipeline_mode = #tpu.pipeline_mode<synchronous>, transform_indices = @transform_3, window_bounds = array<i64: 2, 256>}]} {
    %c0 = arith.constant 0 : index
    %c0_0 = arith.constant 0 : index
    %0 = vector.load %arg1[%c0, %c0_0] : memref<2x32xf32, #tpu.memory_space<vmem>>, vector<2x32xf32>
    %c0_1 = arith.constant 0 : index
    %c0_2 = arith.constant 0 : index
    %1 = vector.load %arg2[%c0_1, %c0_2] : memref<32x256xf32, #tpu.memory_space<vmem>>, vector<32x256xf32>
    %cst = arith.constant dense<0.000000e+00> : vector<2x256xf32>
    %2 = tpu.matmul %0, %1, %cst {dimension_numbers = #tpu.dot_dimension_numbers<[1], [0], [0], [1], [0, 0, 1, 1], [], []>} : vector<2x32xf32>, vector<32x256xf32>, vector<2x256xf32> -> vector<2x256xf32>
    %c0_3 = arith.constant 0 : index
    %c0_4 = arith.constant 0 : index
    %3 = vector.load %arg3[%c0_3, %c0_4] : memref<1x256xf32, #tpu.memory_space<vmem>>, vector<1x256xf32>
    %4 = vector.broadcast %3 : vector<1x256xf32> to vector<2x256xf32>
    %5 = arith.addf %2, %4 : vector<2x256xf32>
    %c0_5 = arith.constant 0 : index
    %c0_6 = arith.constant 0 : index
    %6 = vector.load %arg4[%c0_5, %c0_6] : memref<2x256xf32, #tpu.memory_space<vmem>>, vector<2x256xf32>
    tpu.vector_store %arg4[%c0_5, %c0_6], %5 {strides = array<i32>} : memref<2x256xf32, #tpu.memory_space<vmem>>, vector<2x256xf32>,
    return
  }
  func.func @transform_0(%arg0: i32) -> (i32, i32) {
    %c0_i32 = arith.constant 0 : i32
    %c0_i32_0 = arith.constant 0 : i32
    %c0_i32_1 = arith.constant 0 : i32
    return %c0_i32, %c0_i32_0 : i32, i32
  }
  func.func @transform_1(%arg0: i32) -> (i32, i32) {
    %c0_i32 = arith.constant 0 : i32
    %c0_i32_0 = arith.constant 0 : i32
    %c0_i32_1 = arith.constant 0 : i32
    return %c0_i32, %c0_i32_0 : i32, i32
  }
  func.func @transform_2(%arg0: i32) -> (i32, i32) {
    %c0_i32 = arith.constant 0 : i32
    %c0_i32_0 = arith.constant 0 : i32
    %c0_i32_1 = arith.constant 0 : i32
    return %c0_i32, %c0_i32_0 : i32, i32
  }
  func.func @transform_3(%arg0: i32) -> (i32, i32) {
    %c0_i32 = arith.constant 0 : i32
    %c0_i32_0 = arith.constant 0 : i32
    %c0_i32_1 = arith.constant 0 : i32
    return %c0_i32, %c0_i32_0 : i32, i32
  }
}

module attributes {stable_mosaic.version = 11 : i64} {
  func.func @_deconv_cf_kernel(%arg0: i32, %arg1: memref<1x16x16xf32, #tpu.memory_space<vmem>>, %arg2: memref<5x16x16xf32, #tpu.memory_space<vmem>>, %arg3: memref<16x1xf32, #tpu.memory_space<vmem>>, %arg4: memref<1x16x16xf32, #tpu.memory_space<vmem>>, %arg5: memref<16x272xf32, #tpu.memory_space<vmem>>) attributes {dimension_semantics = [#tpu.dimension_semantics<parallel>], iteration_bounds = array<i64: 2>, scalar_prefetch = 0 : i64, scratch_operands = 1 : i64, tpu.core_type = #tpu.core_type<tc>, window_params = [{transform_indices = @transform_0, window_bounds = array<i64: 1, 16, 16>}, {pipeline_mode = #tpu.pipeline_mode<synchronous>, transform_indices = @transform_1, window_bounds = array<i64: 5, 16, 16>}, {pipeline_mode = #tpu.pipeline_mode<synchronous>, transform_indices = @transform_2, window_bounds = array<i64: 16, 1>}, {transform_indices = @transform_3, window_bounds = array<i64: 1, 16, 16>}]} {
    %cst = arith.constant 0.000000e+00 : f32
    %0 = vector.broadcast %cst : f32 to vector<16x128xf32>
    %c0 = arith.constant 0 : index
    %c0_0 = arith.constant 0 : index
    %1 = vector.load %arg5[%c0, %c0_0] : memref<16x272xf32, #tpu.memory_space<vmem>>, vector<16x128xf32>
    tpu.vector_store %arg5[%c0, %c0_0], %0 {strides = array<i32>} : memref<16x272xf32, #tpu.memory_space<vmem>>, vector<16x128xf32>,
    %c0_1 = arith.constant 0 : index
    %c144 = arith.constant 144 : index
    %2 = vector.load %arg5[%c0_1, %c144] : memref<16x272xf32, #tpu.memory_space<vmem>>, vector<16x128xf32>
    tpu.vector_store %arg5[%c0_1, %c144], %0 {strides = array<i32>} : memref<16x272xf32, #tpu.memory_space<vmem>>, vector<16x128xf32>,
    %c0_2 = arith.constant 0 : index
    %c0_3 = arith.constant 0 : index
    %c0_4 = arith.constant 0 : index
    %3 = vector.load %arg1[%c0_2, %c0_3, %c0_4] : memref<1x16x16xf32, #tpu.memory_space<vmem>>, vector<1x16x16xf32>
    %4 = vector.shape_cast %3 : vector<1x16x16xf32> to vector<16x16xf32>
    %c0_5 = arith.constant 0 : index
    %c128 = arith.constant 128 : index
    %5 = vector.load %arg5[%c0_5, %c128] : memref<16x272xf32, #tpu.memory_space<vmem>>, vector<16x16xf32>
    tpu.vector_store %arg5[%c0_5, %c128], %4 {strides = array<i32>} : memref<16x272xf32, #tpu.memory_space<vmem>>, vector<16x16xf32>,
    %c0_6 = arith.constant 0 : index
    %c0_7 = arith.constant 0 : index
    %6 = vector.load %arg3[%c0_6, %c0_7] : memref<16x1xf32, #tpu.memory_space<vmem>>, vector<16x1xf32>
    %cst_8 = arith.constant 0.000000e+00 : f32
    %7 = vector.broadcast %cst_8 : f32 to vector<16x16xf32>
    %c0_9 = arith.constant 0 : index
    %c126 = arith.constant 126 : index
    %8 = vector.load %arg5[%c0_9, %c126] : memref<16x272xf32, #tpu.memory_space<vmem>>, vector<16x16xf32>
    %c0_10 = arith.constant 0 : index
    %c0_11 = arith.constant 0 : index
    %c0_12 = arith.constant 0 : index
    %9 = vector.load %arg2[%c0_10, %c0_11, %c0_12] : memref<5x16x16xf32, #tpu.memory_space<vmem>>, vector<1x16x16xf32>
    %10 = vector.shape_cast %9 : vector<1x16x16xf32> to vector<16x16xf32>
    %cst_13 = arith.constant dense<0.000000e+00> : vector<16x16xf32>
    %11 = tpu.matmul %10, %8, %cst_13 {dimension_numbers = #tpu.dot_dimension_numbers<[1], [0], [0], [1], [0, 0, 1, 1], [], []>} : vector<16x16xf32>, vector<16x16xf32>, vector<16x16xf32> -> vector<16x16xf32>
    %12 = arith.addf %7, %11 : vector<16x16xf32>
    %c0_14 = arith.constant 0 : index
    %c127 = arith.constant 127 : index
    %13 = vector.load %arg5[%c0_14, %c127] : memref<16x272xf32, #tpu.memory_space<vmem>>, vector<16x16xf32>
    %c1 = arith.constant 1 : index
    %c0_15 = arith.constant 0 : index
    %c0_16 = arith.constant 0 : index
    %14 = vector.load %arg2[%c1, %c0_15, %c0_16] : memref<5x16x16xf32, #tpu.memory_space<vmem>>, vector<1x16x16xf32>
    %15 = vector.shape_cast %14 : vector<1x16x16xf32> to vector<16x16xf32>
    %cst_17 = arith.constant dense<0.000000e+00> : vector<16x16xf32>
    %16 = tpu.matmul %15, %13, %cst_17 {dimension_numbers = #tpu.dot_dimension_numbers<[1], [0], [0], [1], [0, 0, 1, 1], [], []>} : vector<16x16xf32>, vector<16x16xf32>, vector<16x16xf32> -> vector<16x16xf32>
    %17 = arith.addf %12, %16 : vector<16x16xf32>
    %c0_18 = arith.constant 0 : index
    %c128_19 = arith.constant 128 : index
    %18 = vector.load %arg5[%c0_18, %c128_19] : memref<16x272xf32, #tpu.memory_space<vmem>>, vector<16x16xf32>
    %c2 = arith.constant 2 : index
    %c0_20 = arith.constant 0 : index
    %c0_21 = arith.constant 0 : index
    %19 = vector.load %arg2[%c2, %c0_20, %c0_21] : memref<5x16x16xf32, #tpu.memory_space<vmem>>, vector<1x16x16xf32>
    %20 = vector.shape_cast %19 : vector<1x16x16xf32> to vector<16x16xf32>
    %cst_22 = arith.constant dense<0.000000e+00> : vector<16x16xf32>
    %21 = tpu.matmul %20, %18, %cst_22 {dimension_numbers = #tpu.dot_dimension_numbers<[1], [0], [0], [1], [0, 0, 1, 1], [], []>} : vector<16x16xf32>, vector<16x16xf32>, vector<16x16xf32> -> vector<16x16xf32>
    %22 = arith.addf %17, %21 : vector<16x16xf32>
    %c0_23 = arith.constant 0 : index
    %c129 = arith.constant 129 : index
    %23 = vector.load %arg5[%c0_23, %c129] : memref<16x272xf32, #tpu.memory_space<vmem>>, vector<16x16xf32>
    %c3 = arith.constant 3 : index
    %c0_24 = arith.constant 0 : index
    %c0_25 = arith.constant 0 : index
    %24 = vector.load %arg2[%c3, %c0_24, %c0_25] : memref<5x16x16xf32, #tpu.memory_space<vmem>>, vector<1x16x16xf32>
    %25 = vector.shape_cast %24 : vector<1x16x16xf32> to vector<16x16xf32>
    %cst_26 = arith.constant dense<0.000000e+00> : vector<16x16xf32>
    %26 = tpu.matmul %25, %23, %cst_26 {dimension_numbers = #tpu.dot_dimension_numbers<[1], [0], [0], [1], [0, 0, 1, 1], [], []>} : vector<16x16xf32>, vector<16x16xf32>, vector<16x16xf32> -> vector<16x16xf32>
    %27 = arith.addf %22, %26 : vector<16x16xf32>
    %c0_27 = arith.constant 0 : index
    %c130 = arith.constant 130 : index
    %28 = vector.load %arg5[%c0_27, %c130] : memref<16x272xf32, #tpu.memory_space<vmem>>, vector<16x16xf32>
    %c4 = arith.constant 4 : index
    %c0_28 = arith.constant 0 : index
    %c0_29 = arith.constant 0 : index
    %29 = vector.load %arg2[%c4, %c0_28, %c0_29] : memref<5x16x16xf32, #tpu.memory_space<vmem>>, vector<1x16x16xf32>
    %30 = vector.shape_cast %29 : vector<1x16x16xf32> to vector<16x16xf32>
    %cst_30 = arith.constant dense<0.000000e+00> : vector<16x16xf32>
    %31 = tpu.matmul %30, %28, %cst_30 {dimension_numbers = #tpu.dot_dimension_numbers<[1], [0], [0], [1], [0, 0, 1, 1], [], []>} : vector<16x16xf32>, vector<16x16xf32>, vector<16x16xf32> -> vector<16x16xf32>
    %32 = arith.addf %27, %31 : vector<16x16xf32>
    %33 = vector.broadcast %6 : vector<16x1xf32> to vector<16x16xf32>
    %34 = arith.addf %32, %33 : vector<16x16xf32>
    %cst_31 = arith.constant 0.000000e+00 : f32
    %35 = vector.broadcast %cst_31 : f32 to vector<16x16xf32>
    %36 = arith.maximumf %34, %35 : vector<16x16xf32>
    %c0_32 = arith.constant 0 : index
    %c0_33 = arith.constant 0 : index
    %c0_34 = arith.constant 0 : index
    %37 = vector.load %arg4[%c0_32, %c0_33, %c0_34] : memref<1x16x16xf32, #tpu.memory_space<vmem>>, vector<1x16x16xf32>
    %38 = vector.shape_cast %37 : vector<1x16x16xf32> to vector<16x16xf32>
    %39 = vector.shape_cast %36 : vector<16x16xf32> to vector<1x16x16xf32>
    tpu.vector_store %arg4[%c0_32, %c0_33, %c0_34], %39 {strides = array<i32>} : memref<1x16x16xf32, #tpu.memory_space<vmem>>, vector<1x16x16xf32>,
    return
  }
  func.func @transform_0(%arg0: i32) -> (i32, i32, i32) {
    %c0_i32 = arith.constant 0 : i32
    %c0_i32_0 = arith.constant 0 : i32
    %c0_i32_1 = arith.constant 0 : i32
    return %arg0, %c0_i32, %c0_i32_0 : i32, i32, i32
  }
  func.func @transform_1(%arg0: i32) -> (i32, i32, i32) {
    %c0_i32 = arith.constant 0 : i32
    %c0_i32_0 = arith.constant 0 : i32
    %c0_i32_1 = arith.constant 0 : i32
    %c0_i32_2 = arith.constant 0 : i32
    return %c0_i32, %c0_i32_0, %c0_i32_1 : i32, i32, i32
  }
  func.func @transform_2(%arg0: i32) -> (i32, i32) {
    %c0_i32 = arith.constant 0 : i32
    %c0_i32_0 = arith.constant 0 : i32
    %c0_i32_1 = arith.constant 0 : i32
    return %c0_i32, %c0_i32_0 : i32, i32
  }
  func.func @transform_3(%arg0: i32) -> (i32, i32, i32) {
    %c0_i32 = arith.constant 0 : i32
    %c0_i32_0 = arith.constant 0 : i32
    %c0_i32_1 = arith.constant 0 : i32
    return %arg0, %c0_i32, %c0_i32_0 : i32, i32, i32
  }
}

module attributes {stable_mosaic.version = 11 : i64} {
  func.func @_deconv_cf_kernel(%arg0: i32, %arg1: memref<1x8x32xf32, #tpu.memory_space<vmem>>, %arg2: memref<5x8x8xf32, #tpu.memory_space<vmem>>, %arg3: memref<8x1xf32, #tpu.memory_space<vmem>>, %arg4: memref<1x8x32xf32, #tpu.memory_space<vmem>>, %arg5: memref<8x288xf32, #tpu.memory_space<vmem>>) attributes {dimension_semantics = [#tpu.dimension_semantics<parallel>], iteration_bounds = array<i64: 2>, scalar_prefetch = 0 : i64, scratch_operands = 1 : i64, tpu.core_type = #tpu.core_type<tc>, window_params = [{transform_indices = @transform_0, window_bounds = array<i64: 1, 8, 32>}, {pipeline_mode = #tpu.pipeline_mode<synchronous>, transform_indices = @transform_1, window_bounds = array<i64: 5, 8, 8>}, {pipeline_mode = #tpu.pipeline_mode<synchronous>, transform_indices = @transform_2, window_bounds = array<i64: 8, 1>}, {transform_indices = @transform_3, window_bounds = array<i64: 1, 8, 32>}]} {
    %cst = arith.constant 0.000000e+00 : f32
    %0 = vector.broadcast %cst : f32 to vector<8x128xf32>
    %c0 = arith.constant 0 : index
    %c0_0 = arith.constant 0 : index
    %1 = vector.load %arg5[%c0, %c0_0] : memref<8x288xf32, #tpu.memory_space<vmem>>, vector<8x128xf32>
    tpu.vector_store %arg5[%c0, %c0_0], %0 {strides = array<i32>} : memref<8x288xf32, #tpu.memory_space<vmem>>, vector<8x128xf32>,
    %c0_1 = arith.constant 0 : index
    %c160 = arith.constant 160 : index
    %2 = vector.load %arg5[%c0_1, %c160] : memref<8x288xf32, #tpu.memory_space<vmem>>, vector<8x128xf32>
    tpu.vector_store %arg5[%c0_1, %c160], %0 {strides = array<i32>} : memref<8x288xf32, #tpu.memory_space<vmem>>, vector<8x128xf32>,
    %c0_2 = arith.constant 0 : index
    %c0_3 = arith.constant 0 : index
    %c0_4 = arith.constant 0 : index
    %3 = vector.load %arg1[%c0_2, %c0_3, %c0_4] : memref<1x8x32xf32, #tpu.memory_space<vmem>>, vector<1x8x32xf32>
    %4 = vector.shape_cast %3 : vector<1x8x32xf32> to vector<8x32xf32>
    %c0_5 = arith.constant 0 : index
    %c128 = arith.constant 128 : index
    %5 = vector.load %arg5[%c0_5, %c128] : memref<8x288xf32, #tpu.memory_space<vmem>>, vector<8x32xf32>
    tpu.vector_store %arg5[%c0_5, %c128], %4 {strides = array<i32>} : memref<8x288xf32, #tpu.memory_space<vmem>>, vector<8x32xf32>,
    %c0_6 = arith.constant 0 : index
    %c0_7 = arith.constant 0 : index
    %6 = vector.load %arg3[%c0_6, %c0_7] : memref<8x1xf32, #tpu.memory_space<vmem>>, vector<8x1xf32>
    %cst_8 = arith.constant 0.000000e+00 : f32
    %7 = vector.broadcast %cst_8 : f32 to vector<8x32xf32>
    %c0_9 = arith.constant 0 : index
    %c126 = arith.constant 126 : index
    %8 = vector.load %arg5[%c0_9, %c126] : memref<8x288xf32, #tpu.memory_space<vmem>>, vector<8x32xf32>
    %c0_10 = arith.constant 0 : index
    %c0_11 = arith.constant 0 : index
    %c0_12 = arith.constant 0 : index
    %9 = vector.load %arg2[%c0_10, %c0_11, %c0_12] : memref<5x8x8xf32, #tpu.memory_space<vmem>>, vector<1x8x8xf32>
    %10 = vector.shape_cast %9 : vector<1x8x8xf32> to vector<8x8xf32>
    %cst_13 = arith.constant dense<0.000000e+00> : vector<8x32xf32>
    %11 = tpu.matmul %10, %8, %cst_13 {dimension_numbers = #tpu.dot_dimension_numbers<[1], [0], [0], [1], [0, 0, 1, 1], [], []>} : vector<8x8xf32>, vector<8x32xf32>, vector<8x32xf32> -> vector<8x32xf32>
    %12 = arith.addf %7, %11 : vector<8x32xf32>
    %c0_14 = arith.constant 0 : index
    %c127 = arith.constant 127 : index
    %13 = vector.load %arg5[%c0_14, %c127] : memref<8x288xf32, #tpu.memory_space<vmem>>, vector<8x32xf32>
    %c1 = arith.constant 1 : index
    %c0_15 = arith.constant 0 : index
    %c0_16 = arith.constant 0 : index
    %14 = vector.load %arg2[%c1, %c0_15, %c0_16] : memref<5x8x8xf32, #tpu.memory_space<vmem>>, vector<1x8x8xf32>
    %15 = vector.shape_cast %14 : vector<1x8x8xf32> to vector<8x8xf32>
    %cst_17 = arith.constant dense<0.000000e+00> : vector<8x32xf32>
    %16 = tpu.matmul %15, %13, %cst_17 {dimension_numbers = #tpu.dot_dimension_numbers<[1], [0], [0], [1], [0, 0, 1, 1], [], []>} : vector<8x8xf32>, vector<8x32xf32>, vector<8x32xf32> -> vector<8x32xf32>
    %17 = arith.addf %12, %16 : vector<8x32xf32>
    %c0_18 = arith.constant 0 : index
    %c128_19 = arith.constant 128 : index
    %18 = vector.load %arg5[%c0_18, %c128_19] : memref<8x288xf32, #tpu.memory_space<vmem>>, vector<8x32xf32>
    %c2 = arith.constant 2 : index
    %c0_20 = arith.constant 0 : index
    %c0_21 = arith.constant 0 : index
    %19 = vector.load %arg2[%c2, %c0_20, %c0_21] : memref<5x8x8xf32, #tpu.memory_space<vmem>>, vector<1x8x8xf32>
    %20 = vector.shape_cast %19 : vector<1x8x8xf32> to vector<8x8xf32>
    %cst_22 = arith.constant dense<0.000000e+00> : vector<8x32xf32>
    %21 = tpu.matmul %20, %18, %cst_22 {dimension_numbers = #tpu.dot_dimension_numbers<[1], [0], [0], [1], [0, 0, 1, 1], [], []>} : vector<8x8xf32>, vector<8x32xf32>, vector<8x32xf32> -> vector<8x32xf32>
    %22 = arith.addf %17, %21 : vector<8x32xf32>
    %c0_23 = arith.constant 0 : index
    %c129 = arith.constant 129 : index
    %23 = vector.load %arg5[%c0_23, %c129] : memref<8x288xf32, #tpu.memory_space<vmem>>, vector<8x32xf32>
    %c3 = arith.constant 3 : index
    %c0_24 = arith.constant 0 : index
    %c0_25 = arith.constant 0 : index
    %24 = vector.load %arg2[%c3, %c0_24, %c0_25] : memref<5x8x8xf32, #tpu.memory_space<vmem>>, vector<1x8x8xf32>
    %25 = vector.shape_cast %24 : vector<1x8x8xf32> to vector<8x8xf32>
    %cst_26 = arith.constant dense<0.000000e+00> : vector<8x32xf32>
    %26 = tpu.matmul %25, %23, %cst_26 {dimension_numbers = #tpu.dot_dimension_numbers<[1], [0], [0], [1], [0, 0, 1, 1], [], []>} : vector<8x8xf32>, vector<8x32xf32>, vector<8x32xf32> -> vector<8x32xf32>
    %27 = arith.addf %22, %26 : vector<8x32xf32>
    %c0_27 = arith.constant 0 : index
    %c130 = arith.constant 130 : index
    %28 = vector.load %arg5[%c0_27, %c130] : memref<8x288xf32, #tpu.memory_space<vmem>>, vector<8x32xf32>
    %c4 = arith.constant 4 : index
    %c0_28 = arith.constant 0 : index
    %c0_29 = arith.constant 0 : index
    %29 = vector.load %arg2[%c4, %c0_28, %c0_29] : memref<5x8x8xf32, #tpu.memory_space<vmem>>, vector<1x8x8xf32>
    %30 = vector.shape_cast %29 : vector<1x8x8xf32> to vector<8x8xf32>
    %cst_30 = arith.constant dense<0.000000e+00> : vector<8x32xf32>
    %31 = tpu.matmul %30, %28, %cst_30 {dimension_numbers = #tpu.dot_dimension_numbers<[1], [0], [0], [1], [0, 0, 1, 1], [], []>} : vector<8x8xf32>, vector<8x32xf32>, vector<8x32xf32> -> vector<8x32xf32>
    %32 = arith.addf %27, %31 : vector<8x32xf32>
    %33 = vector.broadcast %6 : vector<8x1xf32> to vector<8x32xf32>
    %34 = arith.addf %32, %33 : vector<8x32xf32>
    %c0_31 = arith.constant 0 : index
    %c0_32 = arith.constant 0 : index
    %c0_33 = arith.constant 0 : index
    %35 = vector.load %arg4[%c0_31, %c0_32, %c0_33] : memref<1x8x32xf32, #tpu.memory_space<vmem>>, vector<1x8x32xf32>
    %36 = vector.shape_cast %35 : vector<1x8x32xf32> to vector<8x32xf32>
    %37 = vector.shape_cast %34 : vector<8x32xf32> to vector<1x8x32xf32>
    tpu.vector_store %arg4[%c0_31, %c0_32, %c0_33], %37 {strides = array<i32>} : memref<1x8x32xf32, #tpu.memory_space<vmem>>, vector<1x8x32xf32>,
    return
  }
  func.func @transform_0(%arg0: i32) -> (i32, i32, i32) {
    %c0_i32 = arith.constant 0 : i32
    %c0_i32_0 = arith.constant 0 : i32
    %c0_i32_1 = arith.constant 0 : i32
    return %arg0, %c0_i32, %c0_i32_0 : i32, i32, i32
  }
  func.func @transform_1(%arg0: i32) -> (i32, i32, i32) {
    %c0_i32 = arith.constant 0 : i32
    %c0_i32_0 = arith.constant 0 : i32
    %c0_i32_1 = arith.constant 0 : i32
    %c0_i32_2 = arith.constant 0 : i32
    return %c0_i32, %c0_i32_0, %c0_i32_1 : i32, i32, i32
  }
  func.func @transform_2(%arg0: i32) -> (i32, i32) {
    %c0_i32 = arith.constant 0 : i32
    %c0_i32_0 = arith.constant 0 : i32
    %c0_i32_1 = arith.constant 0 : i32
    return %c0_i32, %c0_i32_0 : i32, i32
  }
  func.func @transform_3(%arg0: i32) -> (i32, i32, i32) {
    %c0_i32 = arith.constant 0 : i32
    %c0_i32_0 = arith.constant 0 : i32
    %c0_i32_1 = arith.constant 0 : i32
    return %arg0, %c0_i32, %c0_i32_0 : i32, i32, i32
  }
}

</mosaic_0001>

<bundles_post_ra>
// kernel: wavegan_generator_forward.4
= control target key start
LH: loop header
LB: loop body
LE: loop exit
PB: predicated region body
PF: predicated region fallthrough
CT: control target
= control target key end

     0   :  { %8 = vsyncpa [#allocation3], 0  ;;  %s169_s12 = smov [#allocation2]   ;;  %s205_s0 = inlined_call_operand.vmem [shape: f32[2,32], index: 0, kind: input, shape index: {}]   ;;  %s206_s1 = inlined_call_operand.hbm [shape: f32[32,256], index: 1, kind: input, shape index: {}]   ;;  %s207_s2 = inlined_call_operand.vmem [shape: f32[1,256], index: 2, kind: input, shape index: {}]   ;;  %s208_s3 = inlined_call_operand.vmem [shape: f32[2,256], index: 3, kind: output, shape index: {}]  }
   0x1   :  { %s16_s13 = sshll.u32 %s169_s12, 4  ;;  %s17_s13 = int_to_ptr.vmem [resolvable:$true] %s16_s13 }
   0x2   :  { %s155_s14 = scalar_lea.vmem %s17_s13, 1024  ;;  %p160_p1 = scmp.lt.s32.totalorder %s17_s13, %s17_s13 }
   0x3   :  { %p156_p0 = scmp.ne.s32.totalorder %s17_s13, %s155_s14  ;;  %p161_p2 = scmp.lt.s32.totalorder %s155_s14, %s155_s14 }
   0x5   :  { %p162_p3 = por %p161_p2, %p160_p1 }
   0x7   :  { %p163_p4 = pnand %p162_p3, %p156_p0 }
   0x9   :  { %166 = shalt.err (!%p163_p4)
}
   0xa   :  { %s170_s15 = smov 256   ;;  %s171_s16 = smov 16  }
   0xb   :  { %22 = dma.hbm_to_vmem [thread:$0]  %s206_s1, 1024, %s17_s13, [#allocation3], %s170_s15, %s170_s15, %s171_s16  }
   0xc   :  { %167 = dma.done.wait [#allocation3], 1024  }
   0xd   :  { %168 = vsyncadd [#allocation3], 4294966272  ;;  %v172_v0 = vmov 0.0   ;;  %v36_v1 = vld [vmem:[#allocation2 + $0x38] sm:$0xff]  ;;  %v35_v2 = vld [vmem:[#allocation2 + $0x30] sm:$0xff]  ;;  %vm49_vm0 = vcmask 261120   ;;  %v39_v10 = vlaneseq }
   0xe   :  { %117 = vmatprep.mubr.f32.mxu0 %v172_v0  ;;  %v34_v3 = vld [vmem:[#allocation2 + $0x28] sm:$0xff]  ;;  %77 = vmatprep.subr.mxu0 %v36_v1  ;;  %v33_v4 = vld [vmem:[#allocation2 + $0x20] sm:$0xff]  ;;  %v32_v5 = vld [vmem:[#allocation2 + $0x18] sm:$0xff] }
   0xf   :  { %78 = vmatpush1.msra.mxu0 %v35_v2  ;;  %v31_v6 = vld [vmem:[#allocation2 + $0x10] sm:$0xff]  ;;  %v30_v7 = vld [vmem:[#allocation2 + $0x8] sm:$0xff]  ;;  %v29_v8 = vld [vmem:[#allocation2] sm:$0xff]  ;;  %v40_v11 = vshrl.u32 %v39_v10, 7 }
  0x10   :  { %79 = vmatprep.subr.mxu0 %v34_v3  ;;  %v28_v9 = vld [vmem:[%s205_s0] sm:$0x3] }
  0x11   :  { %80 = vmatpush1.msra.mxu0 %v33_v4  ;;  %v41_v12 = vsub.s32 0, %v40_v11  ;;  %v45_v13 = vsub.s32 1, %v40_v11  ;;  %v37_v14 = vld [vmem:[%s207_s2] sm:$0x3] }
  0x12   :  { %81 = vmatprep.subr.mxu0 %v32_v5 }
  0x13   :  { %82 = vmatpush1.msra.mxu0 %v31_v6  ;;  %v42_v15 = vrot.slane %v37_v14, %v41_v12  ;;  %v46_v16 = vrot.slane %v37_v14, %v45_v13 }
  0x14   :  { %83 = vmatprep.subr.mxu0 %v30_v7 }
  0x15   :  { %84 = vmatpush1.msra.mxu0 %v29_v8 }
  0x16   :  { %141 = vmatmul.mubr.msk.f32.vlgmr.msra.gmra.mxu0 %vm49_vm0, %v28_v9 }
  0xd6   :  { %v119_v17 = vpop.f32.mrf.mxu0 }
  0xd7   :  { %v120_v19 = vadd.f32 %v119_v17, %v42_v15 }
  0xd8   :  { %v121_v18 = vpop.f32.mrf.mxu0 }
  0xd9   :  { %v122_v20 = vadd.f32 %v121_v18, %v46_v16 }
  0xdb   :  { %v126_v21 = vcombine.low %v120_v19, %v122_v20 }
  0xdd   :  { %142 = vst.sshfl [vmem:[%s208_s3] sm:$0x33 pattern:$0x76325410] %v126_v21 }
  0xde   :  { %140 = vsyncpa [#allocation3], 1 }

// kernel: wavegan_generator_forward.5
= control target key start
LH: loop header
LB: loop body
LE: loop exit
PB: predicated region body
PF: predicated region fallthrough
CT: control target
= control target key end

     0   :  { %s1133_s12 = smov 0   ;;  %s1309_s0 = inlined_call_operand.vmem [shape: f32[2,32,8], index: 0, kind: input, shape index: {}]   ;;  %s1310_s1 = inlined_call_operand.vmem [shape: f32[5,32,32], index: 1, kind: input, shape index: {}]   ;;  %s1311_s2 = inlined_call_operand.vmem [shape: f32[32,1], index: 2, kind: input, shape index: {}]   ;;  %s1312_s3 = inlined_call_operand.vmem [shape: f32[2,32,8], index: 3, kind: output, shape index: {}]  }
   0x1 LB: > { %s896_s13 = sadd.s32 4294967295, %s1105_s12   ;;  %p900_p0 = scmp.ge.s32.totalorder %s1105_s12, 1  ;;  %s1105_s12 = sphi %s1133_s12, %s13_s12  }
   0x2   : > { %p137_p1 = scmp.lt.s32.totalorder %s1105_s12, 3 }
   0x4   : > { %p138_p2 = pnand %p900_p0, %p137_p1 }
   0x5   : > { %p161_p3 = scmp.lt.s32.totalorder (!%p138_p2), %s896_s13, 1  ;;  %s1108_s14 = smov (!%p138_p2), 2  }
   0x6   : > { %141 = sbr.rel (%p138_p2) target bundleno = 380 (0x17c), region = 32  ;;  %s1109_s15 = smov (!%p138_p2), 1  }
   0x7   : > { %s1110_s24 = smov (!%p138_p2), 127   ;;  %s1111_s25 = smov (!%p138_p2), 126  }
   0xb   : > { %vm175_vm0 = vcmask 1047616   ;;  %vm177_vm1 = vcmask 64512   ;;  %v1107_v0 = vmov 0.0   ;;  %s1314_s13 = smov (!%p161_p3, %s896_s13), 1  ;;  %v905_v6 = vld [vmem:[%s1310_s1 + $0x20] sm:$0xff]  ;;  %vm247_vm2 = vcmask 261120  }
   0xc   : > { %183 = vst.msk [vmem:[#allocation2 + $0x50] sm:$0xff] %vm175_vm0, %v1107_v0  ;;  %176 = vst.msk [vmem:[#allocation2 + $0x8] sm:$0xff] %vm175_vm0, %v1107_v0  ;;  %1083 = vrot.lane.b32.xlu1 %v1107_v0, %s1108_s14  ;;  %1078 = vrot.lane.b32.xlu0 %v1107_v0, %s1109_s15  ;;  %s943_s16 = sshll.u32 %s1314_s13, 5  ;;  %v205_v8 = vld [vmem:[%s1310_s1] sm:$0xff]  ;;  %v1112_v11 = vmov 0   ;;  %v194_v13 = vld [vmem:[%s1311_s2 + $0x8] sm:$0xff] }
   0xd   : > { %179 = vst.msk [vmem:[#allocation2 + $0x20] sm:$0xff] %vm175_vm0, %v1107_v0  ;;  %181 = vst.msk [vmem:[#allocation2 + $0x38] sm:$0xff] %vm175_vm0, %v1107_v0  ;;  %s165_s19 = scalar_lea.vmem %s1309_s0, %s943_s16  ;;  %993 = vmatprep.mubr.msk.f32.mxu0 %vm247_vm2, %v905_v6  ;;  %1007 = vmatprep.mubr.msk.f32.mxu1 %vm247_vm2, %v205_v8  ;;  %v193_v12 = vld [vmem:[%s1311_s2] sm:$0xff]  ;;  %v196_v14 = vld [vmem:[%s1311_s2 + $0x18] sm:$0xff]  ;;  %vm361_vm3 = vcmask 15360   ;;  %vm238_vm4 = vcmask 7168  }
   0xe   : > { %v188_v1 = vld [vmem:[%s165_s19 + $0x18] sm:$0xff]  ;;  %v187_v2 = vld [vmem:[%s165_s19 + $0x10] sm:$0xff]  ;;  %v186_v3 = vld [vmem:[%s165_s19 + $0x8] sm:$0xff]  ;;  %1098 = vset.pattern.permute.xlu1 %v1112_v11  ;;  %1097 = vset.pattern.permute.xlu0 %v1112_v11 }
   0xf   : > { %192 = vst.msk [vmem:[#allocation2 + $0x50] sm:$0xff] %vm177_vm1, %v188_v1  ;;  %191 = vst.msk [vmem:[#allocation2 + $0x38] sm:$0xff] %vm177_vm1, %v187_v2  ;;  %v185_v4 = vld [vmem:[%s165_s19] sm:$0xff]  ;;  %v195_v15 = vld [vmem:[%s1311_s2 + $0x10] sm:$0xff] }
  0x10   : > { %1088 = vrot.lane.b32.xlu0 %v1107_v0, %s1109_s15  ;;  %190 = vst.msk [vmem:[#allocation2 + $0x20] sm:$0xff] %vm177_vm1, %v186_v3  ;;  %189 = vst.msk [vmem:[#allocation2 + $0x8] sm:$0xff] %vm177_vm1, %v185_v4  ;;  %v906_v41 = vld [vmem:[%s1310_s1 + $0x28] sm:$0xff]  ;;  %v907_v42 = vld [vmem:[%s1310_s1 + $0x30] sm:$0xff] }
  0x11   : > { %v206_v47 = vld [vmem:[%s1310_s1 + $0x8] sm:$0xff]  ;;  %v207_v48 = vld [vmem:[%s1310_s1 + $0x10] sm:$0xff]  ;;  %v908_v49 = vld [vmem:[%s1310_s1 + $0x38] sm:$0xff] }
  0x12   : > { %v208_v52 = vld [vmem:[%s1310_s1 + $0x18] sm:$0xff]  ;;  %v917_v54 = vld [vmem:[%s1310_s1 + $0x40] sm:$0xff]  ;;  %v918_v55 = vld [vmem:[%s1310_s1 + $0x48] sm:$0xff] }
  0x13   : > { %v925_v56 = vld [vmem:[%s1310_s1 + $0x60] sm:$0xff]  ;;  %v926_v58 = vld [vmem:[%s1310_s1 + $0x68] sm:$0xff]  ;;  %v919_v60 = vld [vmem:[%s1310_s1 + $0x50] sm:$0xff] }
  0x14   : > { %v920_v61 = vld [vmem:[%s1310_s1 + $0x58] sm:$0xff]  ;;  %v927_v62 = vld [vmem:[%s1310_s1 + $0x70] sm:$0xff]  ;;  %v933_v2 = vld [vmem:[%s1310_s1 + $0x80] sm:$0xff] }
  0x15   : > { %v935_v3 = vld [vmem:[%s1310_s1 + $0x90] sm:$0xff]  ;;  %v934_v4 = vld [vmem:[%s1310_s1 + $0x88] sm:$0xff] }
  0x16   : > { %v1156_v5 = vld [vmem:[#allocation2 + $0x50] sm:$0xff]  ;;  %v1165_v7 = vld [vmem:[#allocation2 + $0x38] sm:$0xff] }
  0x17   : > { %359 = vrot.lane.b32.xlu1 %v1156_v5, %s1108_s14  ;;  %236 = vrot.lane.b32.xlu0 %v1156_v5, %s1109_s15  ;;  %v1175_v9 = vld [vmem:[#allocation2 + $0x20] sm:$0xff]  ;;  %v1181_v10 = vld [vmem:[#allocation2 + $0x8] sm:$0xff] }
  0x1b   : > { %355 = vrot.lane.b32.xlu1 %v1165_v7, %s1108_s14  ;;  %232 = vrot.lane.b32.xlu0 %v1165_v7, %s1109_s15 }
  0x1f   : > { %228 = vrot.lane.b32.xlu1 %v1175_v9, %s1109_s15  ;;  %1093 = vrot.lane.b32.xlu0 %v1107_v0, %s1108_s14  ;;  %v928_v0 = vld [vmem:[%s1310_s1 + $0x78] sm:$0xff] }
  0x23   : > { %351 = vrot.lane.b32.xlu1 %v1175_v9, %s1108_s14  ;;  %224 = vrot.lane.b32.xlu0 %v1181_v10, %s1109_s15 }
  0x27   : > { %347 = vrot.lane.b32.xlu1 %v1181_v10, %s1108_s14  ;;  %584 = vrot.lane.b32.xlu0 %v1156_v5, %s1110_s24 }
  0x2b   : > { %582 = vrot.lane.b32.xlu1 %v1165_v7, %s1110_s24  ;;  %580 = vrot.lane.b32.xlu0 %v1175_v9, %s1110_s24 }
  0x2f   : > { %578 = vrot.lane.b32.xlu1 %v1181_v10, %s1110_s24  ;;  %702 = vrot.lane.b32.xlu0 %v1156_v5, %s1111_s25  ;;  %s170_s24 = scalar_lea.vmem %s1312_s3, %s943_s16 }
  0x33   : > { %700 = vrot.lane.b32.xlu1 %v1165_v7, %s1111_s25  ;;  %698 = vrot.lane.b32.xlu0 %v1175_v9, %s1111_s25 }
  0x37   : > { %696 = vrot.lane.b32.xlu1 %v1181_v10, %s1111_s25  ;;  %811 = vperm.xlu0 %1097, %v193_v12  }
  0x3b   : > { %816 = vperm.xlu1 %1098, %v194_v13   ;;  %826 = vperm.xlu0 %1097, %v196_v14  }
  0x3f   : > { %821 = vperm.xlu1 %1098, %v195_v15  }
  0x7e   : > { %v1079_v16 = vpop.permute.xlu0 %1078  ;;  %v1084_v17 = vpop.permute.xlu1 %1083 }
  0x7f   : > { %v1085_v19 = vunpack.i.l.bf16 %v1084_v17  ;;  %v1080_v20 = vunpack.i.l.bf16 %v1079_v16  ;;  %v1086_v25 = vunpack.i.h.bf16 %v1084_v17  ;;  %v1081_v26 = vunpack.i.h.bf16 %v1079_v16 }
  0x82   : > { %v1089_v18 = vpop.permute.xlu0 %1088 }
  0x83   : > { %v1090_v31 = vunpack.i.l.bf16 %v1089_v18  ;;  %v1091_v36 = vunpack.i.h.bf16 %v1089_v18 }
  0x89   : > { %v360_v21 = vpop.permute.xlu1 %359  ;;  %v237_v22 = vpop.permute.xlu0 %236 }
  0x8a   : > { %v365_v23 = vsel %vm361_vm3, %v1085_v19, %v360_v21  ;;  %v242_v24 = vsel %vm238_vm4, %v1080_v20, %v237_v22 }
  0x8b   : > { %999 = vmatprep.subr.mxu1 %v365_v23  ;;  %985 = vmatprep.subr.mxu0 %v242_v24 }
  0x8c   : > { %1000 = vmatpush3.msra.mxu1 %v365_v23  ;;  %986 = vmatpush3.msra.mxu0 %v242_v24 }
  0x8d   : > { %v356_v27 = vpop.permute.xlu1 %355  ;;  %v233_v28 = vpop.permute.xlu0 %232 }
  0x8e   : > { %v364_v29 = vsel %vm361_vm3, %v1086_v25, %v356_v27  ;;  %v241_v30 = vsel %vm238_vm4, %v1081_v26, %v233_v28 }
  0x8f   : > { %1001 = vmatprep.subr.mxu1 %v364_v29  ;;  %987 = vmatprep.subr.mxu0 %v241_v30 }
  0x90   : > { %1002 = vmatpush3.msra.mxu1 %v364_v29  ;;  %988 = vmatpush3.msra.mxu0 %v241_v30 }
  0x91   : > { %v229_v32 = vpop.permute.xlu1 %228  ;;  %v1094_v33 = vpop.permute.xlu0 %1093 }
  0x92   : > { %v1095_v34 = vunpack.i.l.bf16 %v1094_v33  ;;  %v240_v35 = vsel %vm238_vm4, %v1090_v31, %v229_v32  ;;  %v1096_v43 = vunpack.i.h.bf16 %v1094_v33 }
  0x93   : > { %989 = vmatprep.subr.mxu0 %v240_v35 }
  0x94   : > { %990 = vmatpush3.msra.mxu0 %v240_v35 }
  0x95   : > { %v352_v37 = vpop.permute.xlu1 %351  ;;  %v225_v38 = vpop.permute.xlu0 %224 }
  0x96   : > { %v363_v39 = vsel %vm361_vm3, %v1095_v34, %v352_v37  ;;  %v239_v40 = vsel %vm238_vm4, %v1091_v36, %v225_v38 }
  0x97   : > { %1003 = vmatprep.subr.mxu1 %v363_v39  ;;  %991 = vmatprep.subr.mxu0 %v239_v40 }
  0x98   : > { %1004 = vmatpush3.msra.mxu1 %v363_v39  ;;  %992 = vmatpush3.msra.mxu0 %v239_v40 }
  0x99   : > { %v348_v44 = vpop.permute.xlu1 %347  ;;  %994 = vmatmul.mubr.msk.f32.vlgmr.msra.gmra.mxu0 %vm247_vm2, %v906_v41  ;;  %1013 = vmatprep.subr.mxu0 %v1156_v5  ;;  %v585_v45 = vpop.permute.xlu0 %584 }
  0x9a   : > { %v362_v46 = vsel %vm361_vm3, %v1096_v43, %v348_v44  ;;  %1014 = vmatpush3.msra.mxu0 %v1156_v5  ;;  %996 = vmatprep.mubr.msk.f32.mxu0 %vm247_vm2, %v907_v42  ;;  %v936_v5 = vld [vmem:[%s1310_s1 + $0x98] sm:$0xff] }
  0x9b   : > { %1005 = vmatprep.subr.mxu1 %v362_v46  ;;  %1015 = vmatprep.subr.mxu0 %v1165_v7 }
  0x9c   : > { %1006 = vmatpush3.msra.mxu1 %v362_v46  ;;  %1016 = vmatpush3.msra.mxu0 %v1165_v7 }
  0x9d   : > { %1008 = vmatmul.mubr.msk.f32.vlgmr.msra.gmra.mxu1 %vm247_vm2, %v206_v47  ;;  %1027 = vmatprep.subr.mxu1 %v585_v45  ;;  %v583_v50 = vpop.permute.xlu1 %582  ;;  %v581_v51 = vpop.permute.xlu0 %580 }
  0x9e   : > { %1028 = vmatpush3.msra.mxu1 %v585_v45  ;;  %1010 = vmatprep.mubr.msk.f32.mxu1 %vm247_vm2, %v207_v48 }
  0x9f   : > { %1029 = vmatprep.subr.mxu1 %v583_v50  ;;  %997 = vmatmul.mubr.msk.f32.gmra.mxu0 %vm247_vm2, %v908_v49 }
  0xa0   : > { %1017 = vmatprep.subr.mxu0 %v1175_v9  ;;  %1030 = vmatpush3.msra.mxu1 %v583_v50 }
  0xa1   : > { %1011 = vmatmul.mubr.msk.f32.gmra.mxu1 %vm247_vm2, %v208_v52  ;;  %1018 = vmatpush3.msra.mxu0 %v1175_v9  ;;  %v579_v53 = vpop.permute.xlu1 %578  ;;  %v703_v57 = vpop.permute.xlu0 %702 }
  0xa2   : > { %1031 = vmatprep.subr.mxu1 %v581_v51  ;;  %1019 = vmatprep.subr.mxu0 %v1181_v10 }
  0xa3   : > { %1032 = vmatpush3.msra.mxu1 %v581_v51  ;;  %1020 = vmatpush3.msra.mxu0 %v1181_v10 }
  0xa4   : > { %1021 = vmatprep.mubr.msk.f32.mxu0 %vm247_vm2, %v917_v54  ;;  %1033 = vmatprep.subr.mxu1 %v579_v53 }
  0xa5   : > { %1022 = vmatmul.mubr.msk.f32.vlgmr.msra.gmra.mxu0 %vm247_vm2, %v918_v55  ;;  %1034 = vmatpush3.msra.mxu1 %v579_v53  ;;  %v701_v59 = vpop.permute.xlu1 %700  ;;  %v699_v63 = vpop.permute.xlu0 %698 }
  0xa6   : > { %1035 = vmatprep.mubr.msk.f32.mxu1 %vm247_vm2, %v925_v56  ;;  %1041 = vmatprep.subr.mxu0 %v703_v57 }
  0xa7   : > { %1036 = vmatmul.mubr.msk.f32.vlgmr.msra.gmra.mxu1 %vm247_vm2, %v926_v58  ;;  %1055 = vmatprep.subr.mxu1 %v703_v57 }
  0xa8   : > { %1042 = vmatpush3.msra.mxu0 %v703_v57  ;;  %1059 = vmatpush3.msra.mxu1 %v703_v57 }
  0xa9   : > { %1024 = vmatprep.mubr.msk.f32.mxu0 %vm247_vm2, %v919_v60  ;;  %1043 = vmatprep.subr.mxu0 %v701_v59  ;;  %v697_v1 = vpop.permute.xlu1 %696 }
  0xaa   : > { %1056 = vmatprep.subr.mxu1 %v701_v59  ;;  %1025 = vmatmul.mubr.msk.f32.gmra.mxu0 %vm247_vm2, %v920_v61 }
  0xab   : > { %1038 = vmatprep.mubr.msk.f32.mxu1 %vm247_vm2, %v927_v62  ;;  %1044 = vmatpush3.msra.mxu0 %v701_v59 }
  0xac   : > { %1060 = vmatpush3.msra.mxu1 %v701_v59  ;;  %1045 = vmatprep.subr.mxu0 %v699_v63 }
  0xad   : > { %1039 = vmatmul.mubr.msk.f32.gmra.mxu1 %vm247_vm2, %v928_v0  ;;  %1057 = vmatprep.subr.mxu1 %v699_v63 }
  0xae   : > { %1046 = vmatpush3.msra.mxu0 %v699_v63  ;;  %1061 = vmatpush3.msra.mxu1 %v699_v63 }
  0xaf   : > { %1047 = vmatprep.subr.mxu0 %v697_v1  ;;  %1058 = vmatprep.subr.mxu1 %v697_v1 }
  0xb0   : > { %1048 = vmatpush3.msra.mxu0 %v697_v1  ;;  %1062 = vmatpush3.msra.mxu1 %v697_v1 }
  0xb1   : > { %1049 = vmatprep.mubr.msk.f32.mxu0 %vm247_vm2, %v933_v2  ;;  %1052 = vmatprep.mubr.msk.f32.mxu1 %vm247_vm2, %v935_v3 }
  0xb2   : > { %1050 = vmatmul.mubr.msk.f32.vlgmr.msra.gmra.mxu0 %vm247_vm2, %v934_v4  ;;  %1053 = vmatmul.mubr.msk.f32.vlgmr.msra.gmra.mxu1 %vm247_vm2, %v936_v5  ;;  %v812_v22 = vpop.permute.xlu0 %811 }
  0xb6   : > { %v817_v29 = vpop.permute.xlu1 %816  ;;  %v827_v40 = vpop.permute.xlu0 %826 }
  0xba   : > { %v822_v47 = vpop.permute.xlu1 %821 }
 0x159   : > { %v995_v6 = vpop.f32.mrf.mxu0 }
 0x15b   : > { %v326_v7 = vpop.f32.mrf.mxu0 }
 0x15d   : > { %v1009_v8 = vpop.f32.mrf.mxu1 }
 0x15e   : > { %v454_v19 = vadd.f32 %v1009_v8, %v995_v6 }
 0x15f   : > { %v448_v9 = vpop.f32.mrf.mxu1  ;;  %v998_v10 = vpop.f32.mrf.mxu0 }
 0x160   : > { %v449_v24 = vadd.f32 %v448_v9, %v326_v7 }
 0x161   : > { %v1012_v11 = vpop.f32.mrf.mxu1  ;;  %v336_v12 = vpop.f32.mrf.mxu0 }
 0x162   : > { %v464_v20 = vadd.f32 %v1012_v11, %v998_v10 }
 0x163   : > { %v458_v13 = vpop.f32.mrf.mxu1 }
 0x164   : > { %v459_v25 = vadd.f32 %v458_v13, %v336_v12 }
 0x165   : > { %v1023_v14 = vpop.f32.mrf.mxu0 }
 0x166   : > { %v570_v26 = vadd.f32 %v1023_v14, %v454_v19 }
 0x167   : > { %v1037_v15 = vpop.f32.mrf.mxu1  ;;  %v550_v16 = vpop.f32.mrf.mxu0 }
 0x168   : > { %v688_v30 = vadd.f32 %v1037_v15, %v570_v26  ;;  %v569_v31 = vadd.f32 %v550_v16, %v449_v24 }
 0x169   : > { %v668_v17 = vpop.f32.mrf.mxu1 }
 0x16a   : > { %v1026_v18 = vpop.f32.mrf.mxu0  ;;  %v687_v36 = vadd.f32 %v668_v17, %v569_v31 }
 0x16b   : > { %v572_v27 = vadd.f32 %v1026_v18, %v464_v20 }
 0x16c   : > { %v560_v23 = vpop.f32.mrf.mxu0 }
 0x16d   : > { %v1040_v21 = vpop.f32.mrf.mxu1  ;;  %v571_v33 = vadd.f32 %v560_v23, %v459_v25 }
 0x16e   : > { %v690_v32 = vadd.f32 %v1040_v21, %v572_v27 }
 0x16f   : > { %v678_v28 = vpop.f32.mrf.mxu1 }
 0x170   : > { %v689_v37 = vadd.f32 %v678_v28, %v571_v33 }
 0x172   : > { %v1051_v34 = vpop.f32.mrf.mxu0  ;;  %v1054_v35 = vpop.f32.mrf.mxu1 }
 0x173   : > { %v806_v38 = vadd.f32 %v1051_v34, %v688_v30  ;;  %v808_v39 = vadd.f32 %v1054_v35, %v690_v32 }
 0x174   : > { %v786_v41 = vpop.f32.mrf.mxu0  ;;  %v796_v42 = vpop.f32.mrf.mxu1 }
 0x175   : > { %v830_v43 = vadd.f32 %v817_v29, %v806_v38  ;;  %v832_v44 = vadd.f32 %v827_v40, %v808_v39  ;;  %v805_v45 = vadd.f32 %v786_v41, %v687_v36  ;;  %v807_v46 = vadd.f32 %v796_v42, %v689_v37 }
 0x177   : > { %v834_v48 = vmax.f32 %v830_v43, 0.0  ;;  %v836_v49 = vmax.f32 %v832_v44, 0.0  ;;  %v829_v50 = vadd.f32 %v812_v22, %v805_v45  ;;  %v831_v51 = vadd.f32 %v822_v47, %v807_v46 }
 0x179   : > { %838 = vst.msk [vmem:[%s170_s24 + $0x8] sm:$0xff] %vm177_vm1, %v834_v48  ;;  %840 = vst.msk [vmem:[%s170_s24 + $0x18] sm:$0xff] %vm177_vm1, %v836_v49  ;;  %v833_v52 = vmax.f32 %v829_v50, 0.0  ;;  %v835_v53 = vmax.f32 %v831_v51, 0.0 }
 0x17b   : > { %837 = vst.msk [vmem:[%s170_s24] sm:$0xff] %vm177_vm1, %v833_v52  ;;  %839 = vst.msk [vmem:[%s170_s24 + $0x10] sm:$0xff] %vm177_vm1, %v835_v53 }
 0x17c PF: > { %s13_s12 = sadd.s32 1, %s1105_s12  }
 0x17d   : > { %p10_p4 = scmp.ge.s32.totalorder %s13_s12, 4  }
 0x17f   :  { %12 = sbr.rel (!%p10_p4) target bundleno = 1 (0x1), region = 66 }

// kernel: wavegan_generator_forward.6
= control target key start
LH: loop header
LB: loop body
LE: loop exit
PB: predicated region body
PF: predicated region fallthrough
CT: control target
= control target key end

     0   :  { %s873_s12 = smov 0   ;;  %s947_s0 = inlined_call_operand.vmem [shape: f32[2,16,16], index: 0, kind: input, shape index: {}]   ;;  %s948_s1 = inlined_call_operand.vmem [shape: f32[5,16,16], index: 1, kind: input, shape index: {}]   ;;  %s949_s2 = inlined_call_operand.vmem [shape: f32[16,1], index: 2, kind: input, shape index: {}]   ;;  %s950_s3 = inlined_call_operand.vmem [shape: f32[2,16,16], index: 3, kind: output, shape index: {}]  }
   0x1 LB: > { %s727_s13 = sadd.s32 4294967295, %s845_s12   ;;  %p731_p0 = scmp.ge.s32.totalorder %s845_s12, 1  ;;  %s845_s12 = sphi %s873_s12, %s13_s12  }
   0x2   : > { %p137_p1 = scmp.lt.s32.totalorder %s845_s12, 3 }
   0x4   : > { %p138_p2 = pnand %p731_p0, %p137_p1 }
   0x5   : > { %p161_p3 = scmp.lt.s32.totalorder (!%p138_p2), %s727_s13, 1  ;;  %s848_s14 = smov (!%p138_p2), 2  }
   0x6   : > { %141 = sbr.rel (%p138_p2) target bundleno = 357 (0x165), region = 32  ;;  %s849_s15 = smov (!%p138_p2), 1  }
   0x7   : > { %s851_s24 = smov (!%p138_p2), 127   ;;  %s852_s25 = smov (!%p138_p2), 126  }
   0xb   : > { %vm175_vm0 = vcmask 130048   ;;  %vm173_vm1 = vcmask 1047680   ;;  %v847_v0 = vmov 0.0   ;;  %s952_s13 = smov (!%p161_p3, %s727_s13), 1  ;;  %v736_v3 = vld [vmem:[%s948_s1 + $0x10] sm:$0xff]  ;;  %v189_v4 = vld [vmem:[%s948_s1] sm:$0xff] }
   0xc   : > { %177 = vst.msk [vmem:[#allocation2 + $0x20] sm:$0xff] %vm173_vm1, %v847_v0  ;;  %174 = vst.msk [vmem:[#allocation2 + $0x8] sm:$0xff] %vm173_vm1, %v847_v0  ;;  %833 = vrot.lane.b32.xlu1 %v847_v0, %s848_s14  ;;  %828 = vrot.lane.b32.xlu0 %v847_v0, %s849_s15  ;;  %s756_s16 = sshll.u32 %s952_s13, 4  ;;  %v850_v7 = vmov 0   ;;  %v184_v8 = vld [vmem:[%s949_s2 + $0x8] sm:$0xff]  ;;  %v183_v9 = vld [vmem:[%s949_s2] sm:$0xff] }
   0xd   : > { %s165_s19 = scalar_lea.vmem %s947_s0, %s756_s16  ;;  %782 = vmatprep.mubr.msk.f32.mxu0 %vm175_vm0, %v736_v3  ;;  %789 = vmatprep.mubr.msk.f32.mxu1 %vm175_vm0, %v189_v4  ;;  %vm206_vm2 = vcmask 7168   ;;  %vm300_vm3 = vcmask 15360   ;;  %v737_v19 = vld [vmem:[%s948_s1 + $0x18] sm:$0xff]  ;;  %v190_v25 = vld [vmem:[%s948_s1 + $0x8] sm:$0xff]  ;;  %v742_v28 = vld [vmem:[%s948_s1 + $0x20] sm:$0xff] }
   0xe   : > { %v180_v1 = vld [vmem:[%s165_s19 + $0x8] sm:$0xff]  ;;  %v179_v2 = vld [vmem:[%s165_s19] sm:$0xff]  ;;  %838 = vset.pattern.permute.xlu1 %v850_v7  ;;  %837 = vset.pattern.permute.xlu0 %v850_v7  ;;  %v746_v30 = vld [vmem:[%s948_s1 + $0x30] sm:$0xff] }
   0xf   : > { %182 = vst.msk [vmem:[#allocation2 + $0x20] sm:$0xff] %vm175_vm0, %v180_v1  ;;  %181 = vst.msk [vmem:[#allocation2 + $0x8] sm:$0xff] %vm175_vm0, %v179_v2  ;;  %v743_v29 = vld [vmem:[%s948_s1 + $0x28] sm:$0xff]  ;;  %v747_v32 = vld [vmem:[%s948_s1 + $0x38] sm:$0xff] }
  0x10   : > { %v750_v34 = vld [vmem:[%s948_s1 + $0x40] sm:$0xff]  ;;  %v751_v35 = vld [vmem:[%s948_s1 + $0x48] sm:$0xff] }
  0x16   : > { %v188_v5 = vld [vmem:[#allocation2 + $0x20] sm:$0xff]  ;;  %v186_v6 = vld [vmem:[#allocation2 + $0x8] sm:$0xff] }
  0x17   : > { %204 = vrot.lane.b32.xlu0 %v188_v5, %s849_s15  ;;  %200 = vrot.lane.b32.xlu1 %v186_v6, %s849_s15 }
  0x1b   : > { %298 = vrot.lane.b32.xlu0 %v188_v5, %s848_s14  ;;  %294 = vrot.lane.b32.xlu1 %v186_v6, %s848_s14 }
  0x1f   : > { %477 = vrot.lane.b32.xlu0 %v188_v5, %s851_s24  ;;  %475 = vrot.lane.b32.xlu1 %v186_v6, %s851_s24  ;;  %s170_s24 = scalar_lea.vmem %s950_s3, %s756_s16 }
  0x23   : > { %569 = vrot.lane.b32.xlu0 %v188_v5, %s852_s25  ;;  %567 = vrot.lane.b32.xlu1 %v186_v6, %s852_s25 }
  0x27   : > { %663 = vperm.xlu1 %838, %v184_v8   ;;  %658 = vperm.xlu0 %837, %v183_v9  }
  0x7e   : > { %v834_v10 = vpop.permute.xlu1 %833  ;;  %v829_v11 = vpop.permute.xlu0 %828 }
  0x7f   : > { %v830_v12 = vunpack.i.l.bf16 %v829_v11  ;;  %v831_v15 = vunpack.i.h.bf16 %v829_v11  ;;  %v835_v17 = vunpack.i.l.bf16 %v834_v10  ;;  %v836_v22 = vunpack.i.h.bf16 %v834_v10 }
  0x89   : > { %v205_v13 = vpop.permute.xlu0 %204  ;;  %v201_v14 = vpop.permute.xlu1 %200 }
  0x8a   : > { %v208_v16 = vsel %vm206_vm2, %v830_v12, %v205_v13  ;;  %v207_v18 = vsel %vm206_vm2, %v831_v15, %v201_v14 }
  0x8b   : > { %778 = vmatprep.subr.mxu0 %v208_v16 }
  0x8c   : > { %779 = vmatpush3.msra.mxu0 %v208_v16 }
  0x8d   : > { %v299_v20 = vpop.permute.xlu0 %298  ;;  %780 = vmatprep.subr.mxu0 %v207_v18  ;;  %v295_v21 = vpop.permute.xlu1 %294 }
  0x8e   : > { %781 = vmatpush3.msra.mxu0 %v207_v18  ;;  %v302_v23 = vsel %vm300_vm3, %v835_v17, %v299_v20  ;;  %v301_v24 = vsel %vm300_vm3, %v836_v22, %v295_v21 }
  0x8f   : > { %785 = vmatprep.subr.mxu1 %v302_v23  ;;  %783 = vmatmul.mubr.msk.f32.vlgmr.msra.gmra.mxu0 %vm175_vm0, %v737_v19 }
  0x90   : > { %786 = vmatpush3.msra.mxu1 %v302_v23  ;;  %792 = vmatprep.subr.mxu0 %v188_v5 }
  0x91   : > { %v478_v26 = vpop.permute.xlu0 %477  ;;  %787 = vmatprep.subr.mxu1 %v301_v24  ;;  %793 = vmatpush3.msra.mxu0 %v188_v5  ;;  %v476_v27 = vpop.permute.xlu1 %475 }
  0x92   : > { %788 = vmatpush3.msra.mxu1 %v301_v24  ;;  %794 = vmatprep.subr.mxu0 %v186_v6 }
  0x93   : > { %790 = vmatmul.mubr.msk.f32.vlgmr.msra.gmra.mxu1 %vm175_vm0, %v190_v25  ;;  %799 = vmatprep.subr.mxu1 %v478_v26 }
  0x94   : > { %795 = vmatpush3.msra.mxu0 %v186_v6  ;;  %796 = vmatprep.mubr.msk.f32.mxu0 %vm175_vm0, %v742_v28 }
  0x95   : > { %800 = vmatpush3.msra.mxu1 %v478_v26  ;;  %v570_v31 = vpop.permute.xlu0 %569  ;;  %797 = vmatmul.mubr.msk.f32.vlgmr.msra.gmra.mxu0 %vm175_vm0, %v743_v29  ;;  %v568_v33 = vpop.permute.xlu1 %567 }
  0x96   : > { %801 = vmatprep.subr.mxu1 %v476_v27  ;;  %803 = vmatprep.mubr.msk.f32.mxu1 %vm175_vm0, %v746_v30 }
  0x97   : > { %802 = vmatpush3.msra.mxu1 %v476_v27  ;;  %806 = vmatprep.subr.mxu0 %v570_v31 }
  0x98   : > { %804 = vmatmul.mubr.msk.f32.vlgmr.msra.gmra.mxu1 %vm175_vm0, %v747_v32  ;;  %807 = vmatpush3.msra.mxu0 %v570_v31 }
  0x99   : > { %808 = vmatprep.subr.mxu0 %v568_v33  ;;  %810 = vmatprep.mubr.msk.f32.mxu0 %vm175_vm0, %v750_v34 }
  0x9a   : > { %809 = vmatpush3.msra.mxu0 %v568_v33 }
  0x9b   : > { %811 = vmatmul.mubr.msk.f32.vlgmr.msra.gmra.mxu0 %vm175_vm0, %v751_v35 }
  0xa2   : > { %v664_v51 = vpop.permute.xlu1 %663  ;;  %v659_v54 = vpop.permute.xlu0 %658 }
 0x14f   : > { %v784_v36 = vpop.f32.mrf.mxu0 }
 0x151   : > { %v283_v37 = vpop.f32.mrf.mxu0 }
 0x153   : > { %v791_v38 = vpop.f32.mrf.mxu1 }
 0x154   : > { %v383_v39 = vadd.f32 %v791_v38, %v784_v36 }
 0x155   : > { %v377_v40 = vpop.f32.mrf.mxu1  ;;  %v798_v41 = vpop.f32.mrf.mxu0 }
 0x156   : > { %v378_v42 = vadd.f32 %v377_v40, %v283_v37  ;;  %v471_v43 = vadd.f32 %v798_v41, %v383_v39 }
 0x157   : > { %v461_v44 = vpop.f32.mrf.mxu0 }
 0x158   : > { %v470_v45 = vadd.f32 %v461_v44, %v378_v42  ;;  %v805_v46 = vpop.f32.mrf.mxu1 }
 0x159   : > { %v563_v47 = vadd.f32 %v805_v46, %v471_v43 }
 0x15a   : > { %v553_v48 = vpop.f32.mrf.mxu1 }
 0x15b   : > { %v562_v49 = vadd.f32 %v553_v48, %v470_v45  ;;  %v812_v50 = vpop.f32.mrf.mxu0 }
 0x15c   : > { %v655_v52 = vadd.f32 %v812_v50, %v563_v47 }
 0x15d   : > { %v645_v53 = vpop.f32.mrf.mxu0 }
 0x15e   : > { %v654_v55 = vadd.f32 %v645_v53, %v562_v49  ;;  %v667_v56 = vadd.f32 %v664_v51, %v655_v52 }
 0x160   : > { %v669_v57 = vmax.f32 %v667_v56, 0.0  ;;  %v666_v58 = vadd.f32 %v659_v54, %v654_v55 }
 0x162   : > { %671 = vst.msk [vmem:[%s170_s24 + $0x8] sm:$0xff] %vm175_vm0, %v669_v57  ;;  %v668_v59 = vmax.f32 %v666_v58, 0.0 }
 0x164   : > { %670 = vst.msk [vmem:[%s170_s24] sm:$0xff] %vm175_vm0, %v668_v59 }
 0x165 PF: > { %s13_s12 = sadd.s32 1, %s845_s12  }
 0x166   : > { %p10_p4 = scmp.ge.s32.totalorder %s13_s12, 4  }
 0x168   :  { %12 = sbr.rel (!%p10_p4) target bundleno = 1 (0x1), region = 66 }

// kernel: wavegan_generator_forward.7
= control target key start
LH: loop header
LB: loop body
LE: loop exit
PB: predicated region body
PF: predicated region fallthrough
CT: control target
= control target key end

     0   :  { %s740_s12 = smov 0   ;;  %s794_s0 = inlined_call_operand.vmem [shape: f32[2,8,32], index: 0, kind: input, shape index: {}]   ;;  %s795_s1 = inlined_call_operand.vmem [shape: f32[5,8,8], index: 1, kind: input, shape index: {}]   ;;  %s796_s2 = inlined_call_operand.vmem [shape: f32[8,1], index: 2, kind: input, shape index: {}]   ;;  %s797_s3 = inlined_call_operand.vmem [shape: f32[2,8,32], index: 3, kind: output, shape index: {}]  }
   0x1 LB: > { %s636_s13 = sadd.s32 4294967295, %s711_s12   ;;  %p640_p0 = scmp.ge.s32.totalorder %s711_s12, 1  ;;  %s711_s12 = sphi %s740_s12, %s13_s12  }
   0x2   : > { %p136_p1 = scmp.lt.s32.totalorder %s711_s12, 3 }
   0x4   : > { %p137_p2 = pnand %p640_p0, %p136_p1 }
   0x5   : > { %s714_s14 = smov (!%p137_p2), 2   ;;  %s715_s15 = smov (!%p137_p2), 1  }
   0x6   : > { %140 = sbr.rel (%p137_p2) target bundleno = 346 (0x15a), region = 32  ;;  %p158_p3 = scmp.lt.s32.totalorder (!%p137_p2), %s636_s13, 1 }
   0x7   : > { %s718_s20 = smov (!%p137_p2), 127   ;;  %s719_s21 = smov (!%p137_p2), 126  }
   0xb   : > { %vm167_vm0 = vcmask 1047808   ;;  %vm169_vm1 = vcmask 261120   ;;  %v713_v0 = vmov 0.0   ;;  %s799_s13 = smov (!%p158_p3, %s636_s13), 1  ;;  %vm716_vm2 = vmmov 0   ;;  %v173_v4 = vld [vmem:[%s796_s2] sm:$0xff] }
   0xc   : > { %262 = vrot.lane.b32.xlu1 %v713_v0, %s714_s14  ;;  %181 = vrot.lane.b32.xlu0 %v713_v0, %s715_s15  ;;  %168 = vst.msk [vmem:[#allocation2 + $0x8] sm:$0xff] %vm167_vm0, %v713_v0  ;;  %s641_s16 = sshll.u32 %s799_s13, 3  ;;  %v717_v2 = vmov 0   ;;  %vm185_vm3 = vcmask 7168   ;;  %vm266_vm4 = vcmask 15360   ;;  %v643_v9 = vld [vmem:[%s795_s1 + $0x8] sm:$0xff] }
   0xd   : > { %664 = vmatprep.subr.mxu0 %v713_v0  ;;  %669 = vmatprep.subr.mxu1 %v713_v0  ;;  %s161_s19 = scalar_lea.vmem %s794_s0, %s641_s16  ;;  %vm188_vm5 = vcmask 64512   ;;  %v176_v12 = vld [vmem:[%s795_s1] sm:$0xff]  ;;  %v646_v14 = vld [vmem:[%s795_s1 + $0x10] sm:$0xff]  ;;  %v648_v16 = vld [vmem:[%s795_s1 + $0x18] sm:$0xff]  ;;  %s165_s9 = scalar_lea.vmem %s797_s3, %s641_s16 }
   0xe   : > { %666 = vmatprep.mubr.msk.f32.mxu0 %vm716_vm2, %v713_v0  ;;  %671 = vmatprep.mubr.msk.f32.mxu1 %vm716_vm2, %v713_v0  ;;  %v171_v1 = vld [vmem:[%s161_s19] sm:$0xff] }
   0xf   : > { %172 = vst.msk [vmem:[#allocation2 + $0x8] sm:$0xff] %vm169_vm1, %v171_v1  ;;  %704 = vset.pattern.permute.xlu0 %v717_v2  ;;  %v650_v17 = vld [vmem:[%s795_s1 + $0x20] sm:$0xff] }
  0x16   : > { %v175_v3 = vld [vmem:[#allocation2 + $0x8] sm:$0xff] }
  0x17   : > { %264 = vrot.lane.b32.xlu1 %v175_v3, %s714_s14  ;;  %183 = vrot.lane.b32.xlu0 %v175_v3, %s715_s15 }
  0x1b   : > { %420 = vrot.lane.b32.xlu0 %v175_v3, %s718_s20  ;;  %499 = vrot.lane.b32.xlu1 %v175_v3, %s719_s21 }
  0x1f   : > { %578 = vperm.xlu0 %704, %v173_v4  }
  0x7e   : > { %v263_v5 = vpop.permute.xlu1 %262  ;;  %v182_v6 = vpop.permute.xlu0 %181 }
  0x89   : > { %v265_v7 = vpop.permute.xlu1 %264  ;;  %v184_v8 = vpop.permute.xlu0 %183 }
  0x8a   : > { %v186_v10 = vsel %vm185_vm3, %v182_v6, %v184_v8  ;;  %v267_v11 = vsel %vm266_vm4, %v263_v5, %v265_v7 }
  0x8b   : > { %665 = vmatpush3.msra.mxu0 %v186_v10  ;;  %670 = vmatpush3.msra.mxu1 %v267_v11 }
  0x8c   : > { %667 = vmatmul.mubr.msk.f32.vlgmr.msra.gmra.mxu0 %vm188_vm5, %v643_v9  ;;  %674 = vmatprep.subr.mxu0 %v713_v0 }
  0x8d   : > { %672 = vmatmul.mubr.msk.f32.vlgmr.msra.gmra.mxu1 %vm188_vm5, %v176_v12  ;;  %675 = vmatpush3.msra.mxu0 %v175_v3  ;;  %v421_v13 = vpop.permute.xlu0 %420  ;;  %v500_v15 = vpop.permute.xlu1 %499 }
  0x8e   : > { %679 = vmatprep.subr.mxu1 %v713_v0  ;;  %676 = vmatprep.mubr.msk.f32.mxu0 %vm716_vm2, %v713_v0 }
  0x8f   : > { %680 = vmatpush3.msra.mxu1 %v421_v13  ;;  %681 = vmatprep.mubr.msk.f32.mxu1 %vm716_vm2, %v713_v0 }
  0x90   : > { %677 = vmatmul.mubr.msk.f32.vlgmr.msra.gmra.mxu0 %vm188_vm5, %v646_v14  ;;  %684 = vmatprep.subr.mxu0 %v713_v0 }
  0x91   : > { %682 = vmatmul.mubr.msk.f32.vlgmr.msra.gmra.mxu1 %vm188_vm5, %v648_v16  ;;  %685 = vmatpush3.msra.mxu0 %v500_v15 }
  0x92   : > { %686 = vmatprep.mubr.msk.f32.mxu0 %vm716_vm2, %v713_v0 }
  0x94   : > { %687 = vmatmul.mubr.msk.f32.vlgmr.msra.gmra.mxu0 %vm188_vm5, %v650_v17 }
  0x9a   : > { %v579_v30 = vpop.permute.xlu0 %578 }
 0x14c   : > { %v258_v18 = vpop.f32.mrf.mxu0 }
 0x14d   : > { %v338_v19 = vpop.f32.mrf.mxu1 }
 0x14e   : > { %v668_v20 = vpop.f32.mrf.mxu0  ;;  %v339_v21 = vadd.f32 %v338_v19, %v258_v18 }
 0x14f   : > { %v673_v22 = vpop.f32.mrf.mxu1 }
 0x150   : > { %v413_v23 = vpop.f32.mrf.mxu0 }
 0x151   : > { %v417_v24 = vadd.f32 %v413_v23, %v339_v21  ;;  %v492_v25 = vpop.f32.mrf.mxu1 }
 0x152   : > { %v678_v26 = vpop.f32.mrf.mxu0 }
 0x153   : > { %v496_v27 = vadd.f32 %v492_v25, %v417_v24  ;;  %v683_v28 = vpop.f32.mrf.mxu1 }
 0x154   : > { %v571_v29 = vpop.f32.mrf.mxu0 }
 0x155   : > { %v575_v31 = vadd.f32 %v571_v29, %v496_v27 }
 0x156   : > { %v688_v32 = vpop.f32.mrf.mxu0 }
 0x157   : > { %v581_v33 = vadd.f32 %v579_v30, %v575_v31 }
 0x159   : > { %582 = vst.msk [vmem:[%s165_s9] sm:$0xff] %vm169_vm1, %v581_v33 }
 0x15a PF: > { %s13_s12 = sadd.s32 1, %s711_s12  }
 0x15b   : > { %p10_p4 = scmp.ge.s32.totalorder %s13_s12, 4  }
 0x15d   :  { %12 = sbr.rel (!%p10_p4) target bundleno = 1 (0x1), region = 66 }

</bundles_post_ra>
